<compile_context>
chip_gen: v7x
topology: tpu7x:2x2x1
jax: 0.10.0
libtpu: 0.0.40
codegen_flags: <defaults>
</compile_context>

<pallas_src>
import jax
import jax.numpy as jnp
from jax.experimental import pallas as pl
from jax.experimental.pallas import tpu as pltpu

# ---- model hyper-parameters (small, consistent with the forward) -------------------
D_MODEL = 32            # d_model
N_HEAD = 4              # number of attention heads
HEAD_DIM = D_MODEL // N_HEAD
D_FF = 64               # dim_feedforward
NUM_LAYERS = 2          # num_layers
EPS = 1e-5              # LayerNorm eps (PyTorch default)

# packed-slab geometry
W_ROWS = 2 * D_MODEL + D_FF      # 128: rows [0:32)=Wq|Wk|Wv|Wo, [32:64)=W1, [64:128)=W2
W_COLS = 4 * D_MODEL             # 128 (lane-dense)
B_ROWS = 8                       # sublane-padded bias/norm slab
B_COLS = 4 * D_MODEL             # 128 (lane-dense)


def _layer_norm(x, gamma, beta):
    mean = jnp.mean(x, axis=-1, keepdims=True)
    var = jnp.mean((x - mean) ** 2, axis=-1, keepdims=True)
    return (x - mean) * jax.lax.rsqrt(var + EPS) * gamma + beta


def encoder_stack_kernel(x_ref, w_ref, b_ref, o_ref):
    Bsz, S, D = x_ref.shape                     # (2, 8, 32)
    W = w_ref[...]                              # [128, 128] packed weights (one DMA)
    P = b_ref[...]                              # [8, 128]   packed biases/gains (one DMA)

    # static slices of the packed slabs
    w_qkv = W[0:D, 0:3 * D]                     # [D, 3D]  (Wq | Wk | Wv)
    wo = W[0:D, 3 * D:4 * D]                    # [D, D]
    w1 = W[D:2 * D, 0:D_FF]                     # [D, D_FF]
    w2 = W[2 * D:2 * D + D_FF, 0:D]             # [D_FF, D]

    b_qkv = P[0:1, 0:3 * D]                     # [1, 3D]
    bo = P[0:1, 3 * D:4 * D]
    b1 = P[1:2, 0:D_FF]
    b2 = P[2:3, 0:D]
    g1 = P[2:3, D:2 * D]
    be1 = P[2:3, 2 * D:3 * D]
    g2 = P[2:3, 3 * D:4 * D]
    be2 = P[3:4, 0:D]

    x2 = x_ref[...].reshape(Bsz * S, D)         # [B*S, D] -- collapse major dims only
    scale = 1.0 / (HEAD_DIM ** 0.5)

    # _get_clones -> all layers share identical weights; static unroll over layers keeps
    # the activation resident in vregs/VMEM between layers (no HBM round trip).
    for _ in range(NUM_LAYERS):
        # --- multi-head self-attention (no mask / no key-padding mask) --------------
        qkv = jnp.dot(x2, w_qkv, preferred_element_type=jnp.float32) + b_qkv   # [B*S, 3D]
        qkv3 = qkv.reshape(Bsz, S, 3 * D)                                       # split major dim

        ctx_heads = []
        for h in range(N_HEAD):                 # static unroll over 4 heads
            lo = h * HEAD_DIM
            qh = qkv3[:, :, lo:lo + HEAD_DIM]                       # [B, S, hd]
            kh = qkv3[:, :, D + lo:D + lo + HEAD_DIM]
            vh = qkv3[:, :, 2 * D + lo:2 * D + lo + HEAD_DIM]
            s = jnp.einsum("bqd,bkd->bqk", qh, kh,
                           preferred_element_type=jnp.float32) * scale         # [B, S, S]
            s = s - jnp.max(s, axis=-1, keepdims=True)
            p = jnp.exp(s)
            p = p * pl.reciprocal(jnp.sum(p, axis=-1, keepdims=True), approx=True)
            ctx_heads.append(jnp.einsum("bqk,bkd->bqd", p, vh,
                                        preferred_element_type=jnp.float32))   # [B, S, hd]
        ctx = jnp.concatenate(ctx_heads, axis=-1).reshape(Bsz * S, D)           # [B*S, D]
        attn_out = jnp.dot(ctx, wo, preferred_element_type=jnp.float32) + bo

        # --- post-norm residual block 1 ----------------------------------------------
        y = _layer_norm(x2 + attn_out, g1, be1)

        # --- feed-forward (Linear -> ReLU -> Linear) ----------------------------------
        h1 = jnp.maximum(jnp.dot(y, w1, preferred_element_type=jnp.float32) + b1, 0.0)
        ff = jnp.dot(h1, w2, preferred_element_type=jnp.float32) + b2

        # --- post-norm residual block 2 ----------------------------------------------
        x2 = _layer_norm(y + ff, g2, be2)

    o_ref[...] = x2.reshape(Bsz, S, D).astype(o_ref.dtype)


def make_layer_params(key):
    """Deterministic parameter init for one encoder layer (shapes from nn.TransformerEncoderLayer)."""
    ks = jax.random.split(key, 6)
    sd = 1.0 / (D_MODEL ** 0.5)
    sf = 1.0 / (D_FF ** 0.5)
    return dict(
        wq=jax.random.normal(ks[0], (D_MODEL, D_MODEL), jnp.float32) * sd,
        wk=jax.random.normal(ks[1], (D_MODEL, D_MODEL), jnp.float32) * sd,
        wv=jax.random.normal(ks[2], (D_MODEL, D_MODEL), jnp.float32) * sd,
        wo=jax.random.normal(ks[3], (D_MODEL, D_MODEL), jnp.float32) * sd,
        w1=jax.random.normal(ks[4], (D_MODEL, D_FF), jnp.float32) * sd,
        w2=jax.random.normal(ks[5], (D_FF, D_MODEL), jnp.float32) * sf,
        bq=jnp.zeros((D_MODEL,), jnp.float32), bk=jnp.zeros((D_MODEL,), jnp.float32),
        bv=jnp.zeros((D_MODEL,), jnp.float32), bo=jnp.zeros((D_MODEL,), jnp.float32),
        b1=jnp.zeros((D_FF,), jnp.float32), b2=jnp.zeros((D_MODEL,), jnp.float32),
        g1=jnp.ones((D_MODEL,), jnp.float32), be1=jnp.zeros((D_MODEL,), jnp.float32),
        g2=jnp.ones((D_MODEL,), jnp.float32), be2=jnp.zeros((D_MODEL,), jnp.float32),
    )


def pack_layer_params(p):
    """Pack the 16 parameter tensors into two lane-dense slabs (2 DMA descriptors)."""
    D, F = D_MODEL, D_FF
    W = jnp.zeros((W_ROWS, W_COLS), jnp.float32)
    W = W.at[0:D, 0:D].set(p["wq"])
    W = W.at[0:D, D:2 * D].set(p["wk"])
    W = W.at[0:D, 2 * D:3 * D].set(p["wv"])
    W = W.at[0:D, 3 * D:4 * D].set(p["wo"])
    W = W.at[D:2 * D, 0:F].set(p["w1"])
    W = W.at[2 * D:2 * D + F, 0:D].set(p["w2"])

    Bv = jnp.zeros((B_ROWS, B_COLS), jnp.float32)
    Bv = Bv.at[0, 0:D].set(p["bq"])
    Bv = Bv.at[0, D:2 * D].set(p["bk"])
    Bv = Bv.at[0, 2 * D:3 * D].set(p["bv"])
    Bv = Bv.at[0, 3 * D:4 * D].set(p["bo"])
    Bv = Bv.at[1, 0:F].set(p["b1"])
    Bv = Bv.at[2, 0:D].set(p["b2"])
    Bv = Bv.at[2, D:2 * D].set(p["g1"])
    Bv = Bv.at[2, 2 * D:3 * D].set(p["be1"])
    Bv = Bv.at[2, 3 * D:4 * D].set(p["g2"])
    Bv = Bv.at[3, 0:D].set(p["be2"])
    return W, Bv


@jax.jit
def transformer_encoder(src, w_packed, b_packed):
    """TransformerEncoder.forward(src, mask=None); self.norm is None (reference default).

    Eval/inference semantics (dropout p=0.1 of the reference layer is identity in eval()).
    """
    Bsz, S, D = src.shape
    return pl.pallas_call(
        encoder_stack_kernel,
        out_shape=jax.ShapeDtypeStruct(src.shape, src.dtype),
        grid=(1,),                                    # single step: B*S tokens, both layers fused
        in_specs=[
            pl.BlockSpec((Bsz, S, D), lambda i: (0, 0, 0)),
            pl.BlockSpec((W_ROWS, W_COLS), lambda i: (0, 0)),
            pl.BlockSpec((B_ROWS, B_COLS), lambda i: (0, 0)),
        ],
        out_specs=pl.BlockSpec((Bsz, S, D), lambda i: (0, 0, 0)),
        compiler_params=pltpu.CompilerParams(dimension_semantics=("arbitrary",)),
    )(src, w_packed, b_packed)


if __name__ == "__main__":
    key = jax.random.PRNGKey(0)
    k_x, k_p = jax.random.split(key)

    B, S = 2, 8
    src = jax.random.normal(k_x, (B, S, D_MODEL), jnp.float32)
    params = make_layer_params(k_p)
    w_packed, b_packed = pack_layer_params(params)

    # TODO(synk): src_mask / src_key_padding_mask / nested-tensor fast path and training-mode
    # dropout not implemented (reference is exercised with mask=None, eval semantics).
    out = transformer_encoder(src, w_packed, b_packed)
    jax.block_until_ready(out)
    assert out.shape == src.shape and out.dtype == src.dtype
    assert bool(jnp.all(jnp.isfinite(out)))
    print("KERNEL_OK")
</pallas_src>

<mosaic_0001>
module attributes {stable_mosaic.version = 11 : i64} {
  func.func @encoder_stack_kernel(%arg0: i32, %arg1: memref<2x8x32xf32, #tpu.memory_space<vmem>>, %arg2: memref<128x128xf32, #tpu.memory_space<vmem>>, %arg3: memref<8x128xf32, #tpu.memory_space<vmem>>, %arg4: memref<2x8x32xf32, #tpu.memory_space<vmem>>) attributes {dimension_semantics = [#tpu.dimension_semantics<arbitrary>], iteration_bounds = array<i64: 1>, scalar_prefetch = 0 : i64, scratch_operands = 0 : i64, tpu.core_type = #tpu.core_type<tc>, window_params = [{pipeline_mode = #tpu.pipeline_mode<synchronous>, transform_indices = @transform_0, window_bounds = array<i64: 2, 8, 32>}, {pipeline_mode = #tpu.pipeline_mode<synchronous>, transform_indices = @transform_1, window_bounds = array<i64: 128, 128>}, {pipeline_mode = #tpu.pipeline_mode<synchronous>, transform_indices = @transform_2, window_bounds = array<i64: 8, 128>}, {pipeline_mode = #tpu.pipeline_mode<synchronous>, transform_indices = @transform_3, window_bounds = array<i64: 2, 8, 32>}]} {
    %c0 = arith.constant 0 : index
    %c0_0 = arith.constant 0 : index
    %0 = vector.load %arg2[%c0, %c0_0] : memref<128x128xf32, #tpu.memory_space<vmem>>, vector<128x128xf32>
    %c0_1 = arith.constant 0 : index
    %c0_2 = arith.constant 0 : index
    %1 = vector.load %arg3[%c0_1, %c0_2] : memref<8x128xf32, #tpu.memory_space<vmem>>, vector<8x128xf32>
    %2 = vector.extract_strided_slice %0 {offsets = [0, 0], sizes = [32, 96], strides = [1, 1]} : vector<128x128xf32> to vector<32x96xf32>
    %3 = vector.extract_strided_slice %0 {offsets = [0, 96], sizes = [32, 32], strides = [1, 1]} : vector<128x128xf32> to vector<32x32xf32>
    %4 = vector.extract_strided_slice %0 {offsets = [32, 0], sizes = [32, 64], strides = [1, 1]} : vector<128x128xf32> to vector<32x64xf32>
    %5 = vector.extract_strided_slice %0 {offsets = [64, 0], sizes = [64, 32], strides = [1, 1]} : vector<128x128xf32> to vector<64x32xf32>
    %6 = vector.extract_strided_slice %1 {offsets = [0, 0], sizes = [1, 96], strides = [1, 1]} : vector<8x128xf32> to vector<1x96xf32>
    %7 = vector.extract_strided_slice %1 {offsets = [0, 96], sizes = [1, 32], strides = [1, 1]} : vector<8x128xf32> to vector<1x32xf32>
    %8 = vector.extract_strided_slice %1 {offsets = [1, 0], sizes = [1, 64], strides = [1, 1]} : vector<8x128xf32> to vector<1x64xf32>
    %9 = vector.extract_strided_slice %1 {offsets = [2, 0], sizes = [1, 32], strides = [1, 1]} : vector<8x128xf32> to vector<1x32xf32>
    %10 = vector.extract_strided_slice %1 {offsets = [2, 32], sizes = [1, 32], strides = [1, 1]} : vector<8x128xf32> to vector<1x32xf32>
    %11 = vector.extract_strided_slice %1 {offsets = [2, 64], sizes = [1, 32], strides = [1, 1]} : vector<8x128xf32> to vector<1x32xf32>
    %12 = vector.extract_strided_slice %1 {offsets = [2, 96], sizes = [1, 32], strides = [1, 1]} : vector<8x128xf32> to vector<1x32xf32>
    %13 = vector.extract_strided_slice %1 {offsets = [3, 0], sizes = [1, 32], strides = [1, 1]} : vector<8x128xf32> to vector<1x32xf32>
    %c0_3 = arith.constant 0 : index
    %c0_4 = arith.constant 0 : index
    %c0_5 = arith.constant 0 : index
    %14 = vector.load %arg1[%c0_3, %c0_4, %c0_5] : memref<2x8x32xf32, #tpu.memory_space<vmem>>, vector<2x8x32xf32>
    %15 = vector.shape_cast %14 : vector<2x8x32xf32> to vector<16x32xf32>
    %cst = arith.constant dense<0.000000e+00> : vector<16x96xf32>
    %16 = tpu.matmul %15, %2, %cst {dimension_numbers = #tpu.dot_dimension_numbers<[1], [0], [0], [1], [0, 0, 1, 1], [], []>} : vector<16x32xf32>, vector<32x96xf32>, vector<16x96xf32> -> vector<16x96xf32>
    %17 = vector.broadcast %6 : vector<1x96xf32> to vector<16x96xf32>
    %18 = arith.addf %16, %17 : vector<16x96xf32>
    %19 = vector.shape_cast %18 : vector<16x96xf32> to vector<2x8x96xf32>
    %20 = vector.extract_strided_slice %19 {offsets = [0, 0, 0], sizes = [2, 8, 8], strides = [1, 1, 1]} : vector<2x8x96xf32> to vector<2x8x8xf32>
    %21 = vector.extract_strided_slice %19 {offsets = [0, 0, 32], sizes = [2, 8, 8], strides = [1, 1, 1]} : vector<2x8x96xf32> to vector<2x8x8xf32>
    %22 = vector.extract_strided_slice %19 {offsets = [0, 0, 64], sizes = [2, 8, 8], strides = [1, 1, 1]} : vector<2x8x96xf32> to vector<2x8x8xf32>
    "tpu.trace_start"() <{level = 10 : i32, message = "bqd,bkd->bqk"}> : () -> ()
    %cst_6 = arith.constant dense<0.000000e+00> : vector<2x8x8xf32>
    %23 = tpu.matmul %20, %21, %cst_6 {dimension_numbers = #tpu.dot_dimension_numbers<[2], [2], [1], [1], [0, 0, 0, 1, 1, 1], [0], [0]>} : vector<2x8x8xf32>, vector<2x8x8xf32>, vector<2x8x8xf32> -> vector<2x8x8xf32>
    "tpu.trace_stop"() : () -> ()
    %cst_7 = arith.constant 0.353553385 : f32
    %24 = vector.broadcast %cst_7 : f32 to vector<2x8x8xf32>
    %25 = arith.mulf %23, %24 : vector<2x8x8xf32>
    %cst_8 = arith.constant dense<0xFF800000> : vector<2x8xf32>
    %26 = vector.multi_reduction <maximumf>, %25, %cst_8 [2] : vector<2x8x8xf32> to vector<2x8xf32>
    %27 = vector.shape_cast %26 : vector<2x8xf32> to vector<2x8x1xf32>
    %28 = vector.broadcast %27 : vector<2x8x1xf32> to vector<2x8x8xf32>
    %29 = arith.subf %25, %28 : vector<2x8x8xf32>
    %30 = math.exp %29 : vector<2x8x8xf32>
    %cst_9 = arith.constant dense<0.000000e+00> : vector<2x8xf32>
    %31 = vector.multi_reduction <add>, %30, %cst_9 [2] : vector<2x8x8xf32> to vector<2x8xf32>
    %32 = vector.shape_cast %31 : vector<2x8xf32> to vector<2x8x1xf32>
    %33 = tpu.reciprocal %32 {approx = true} : vector<2x8x1xf32> -> vector<2x8x1xf32>
    %34 = vector.broadcast %33 : vector<2x8x1xf32> to vector<2x8x8xf32>
    %35 = arith.mulf %30, %34 : vector<2x8x8xf32>
    "tpu.trace_start"() <{level = 10 : i32, message = "bqk,bkd->bqd"}> : () -> ()
    %cst_10 = arith.constant dense<0.000000e+00> : vector<2x8x8xf32>
    %36 = tpu.matmul %35, %22, %cst_10 {dimension_numbers = #tpu.dot_dimension_numbers<[2], [1], [1], [2], [0, 0, 0, 1, 1, 2], [0], [0]>} : vector<2x8x8xf32>, vector<2x8x8xf32>, vector<2x8x8xf32> -> vector<2x8x8xf32>
    "tpu.trace_stop"() : () -> ()
    %37 = vector.extract_strided_slice %19 {offsets = [0, 0, 8], sizes = [2, 8, 8], strides = [1, 1, 1]} : vector<2x8x96xf32> to vector<2x8x8xf32>
    %38 = vector.extract_strided_slice %19 {offsets = [0, 0, 40], sizes = [2, 8, 8], strides = [1, 1, 1]} : vector<2x8x96xf32> to vector<2x8x8xf32>
    %39 = vector.extract_strided_slice %19 {offsets = [0, 0, 72], sizes = [2, 8, 8], strides = [1, 1, 1]} : vector<2x8x96xf32> to vector<2x8x8xf32>
    "tpu.trace_start"() <{level = 10 : i32, message = "bqd,bkd->bqk"}> : () -> ()
    %cst_11 = arith.constant dense<0.000000e+00> : vector<2x8x8xf32>
    %40 = tpu.matmul %37, %38, %cst_11 {dimension_numbers = #tpu.dot_dimension_numbers<[2], [2], [1], [1], [0, 0, 0, 1, 1, 1], [0], [0]>} : vector<2x8x8xf32>, vector<2x8x8xf32>, vector<2x8x8xf32> -> vector<2x8x8xf32>
    "tpu.trace_stop"() : () -> ()
    %cst_12 = arith.constant 0.353553385 : f32
    %41 = vector.broadcast %cst_12 : f32 to vector<2x8x8xf32>
    %42 = arith.mulf %40, %41 : vector<2x8x8xf32>
    %cst_13 = arith.constant dense<0xFF800000> : vector<2x8xf32>
    %43 = vector.multi_reduction <maximumf>, %42, %cst_13 [2] : vector<2x8x8xf32> to vector<2x8xf32>
    %44 = vector.shape_cast %43 : vector<2x8xf32> to vector<2x8x1xf32>
    %45 = vector.broadcast %44 : vector<2x8x1xf32> to vector<2x8x8xf32>
    %46 = arith.subf %42, %45 : vector<2x8x8xf32>
    %47 = math.exp %46 : vector<2x8x8xf32>
    %cst_14 = arith.constant dense<0.000000e+00> : vector<2x8xf32>
    %48 = vector.multi_reduction <add>, %47, %cst_14 [2] : vector<2x8x8xf32> to vector<2x8xf32>
    %49 = vector.shape_cast %48 : vector<2x8xf32> to vector<2x8x1xf32>
    %50 = tpu.reciprocal %49 {approx = true} : vector<2x8x1xf32> -> vector<2x8x1xf32>
    %51 = vector.broadcast %50 : vector<2x8x1xf32> to vector<2x8x8xf32>
    %52 = arith.mulf %47, %51 : vector<2x8x8xf32>
    "tpu.trace_start"() <{level = 10 : i32, message = "bqk,bkd->bqd"}> : () -> ()
    %cst_15 = arith.constant dense<0.000000e+00> : vector<2x8x8xf32>
    %53 = tpu.matmul %52, %39, %cst_15 {dimension_numbers = #tpu.dot_dimension_numbers<[2], [1], [1], [2], [0, 0, 0, 1, 1, 2], [0], [0]>} : vector<2x8x8xf32>, vector<2x8x8xf32>, vector<2x8x8xf32> -> vector<2x8x8xf32>
    "tpu.trace_stop"() : () -> ()
    %54 = vector.extract_strided_slice %19 {offsets = [0, 0, 16], sizes = [2, 8, 8], strides = [1, 1, 1]} : vector<2x8x96xf32> to vector<2x8x8xf32>
    %55 = vector.extract_strided_slice %19 {offsets = [0, 0, 48], sizes = [2, 8, 8], strides = [1, 1, 1]} : vector<2x8x96xf32> to vector<2x8x8xf32>
    %56 = vector.extract_strided_slice %19 {offsets = [0, 0, 80], sizes = [2, 8, 8], strides = [1, 1, 1]} : vector<2x8x96xf32> to vector<2x8x8xf32>
    "tpu.trace_start"() <{level = 10 : i32, message = "bqd,bkd->bqk"}> : () -> ()
    %cst_16 = arith.constant dense<0.000000e+00> : vector<2x8x8xf32>
    %57 = tpu.matmul %54, %55, %cst_16 {dimension_numbers = #tpu.dot_dimension_numbers<[2], [2], [1], [1], [0, 0, 0, 1, 1, 1], [0], [0]>} : vector<2x8x8xf32>, vector<2x8x8xf32>, vector<2x8x8xf32> -> vector<2x8x8xf32>
    "tpu.trace_stop"() : () -> ()
    %cst_17 = arith.constant 0.353553385 : f32
    %58 = vector.broadcast %cst_17 : f32 to vector<2x8x8xf32>
    %59 = arith.mulf %57, %58 : vector<2x8x8xf32>
    %cst_18 = arith.constant dense<0xFF800000> : vector<2x8xf32>
    %60 = vector.multi_reduction <maximumf>, %59, %cst_18 [2] : vector<2x8x8xf32> to vector<2x8xf32>
    %61 = vector.shape_cast %60 : vector<2x8xf32> to vector<2x8x1xf32>
    %62 = vector.broadcast %61 : vector<2x8x1xf32> to vector<2x8x8xf32>
    %63 = arith.subf %59, %62 : vector<2x8x8xf32>
    %64 = math.exp %63 : vector<2x8x8xf32>
    %cst_19 = arith.constant dense<0.000000e+00> : vector<2x8xf32>
    %65 = vector.multi_reduction <add>, %64, %cst_19 [2] : vector<2x8x8xf32> to vector<2x8xf32>
    %66 = vector.shape_cast %65 : vector<2x8xf32> to vector<2x8x1xf32>
    %67 = tpu.reciprocal %66 {approx = true} : vector<2x8x1xf32> -> vector<2x8x1xf32>
    %68 = vector.broadcast %67 : vector<2x8x1xf32> to vector<2x8x8xf32>
    %69 = arith.mulf %64, %68 : vector<2x8x8xf32>
    "tpu.trace_start"() <{level = 10 : i32, message = "bqk,bkd->bqd"}> : () -> ()
    %cst_20 = arith.constant dense<0.000000e+00> : vector<2x8x8xf32>
    %70 = tpu.matmul %69, %56, %cst_20 {dimension_numbers = #tpu.dot_dimension_numbers<[2], [1], [1], [2], [0, 0, 0, 1, 1, 2], [0], [0]>} : vector<2x8x8xf32>, vector<2x8x8xf32>, vector<2x8x8xf32> -> vector<2x8x8xf32>
    "tpu.trace_stop"() : () -> ()
    %71 = vector.extract_strided_slice %19 {offsets = [0, 0, 24], sizes = [2, 8, 8], strides = [1, 1, 1]} : vector<2x8x96xf32> to vector<2x8x8xf32>
    %72 = vector.extract_strided_slice %19 {offsets = [0, 0, 56], sizes = [2, 8, 8], strides = [1, 1, 1]} : vector<2x8x96xf32> to vector<2x8x8xf32>
    %73 = vector.extract_strided_slice %19 {offsets = [0, 0, 88], sizes = [2, 8, 8], strides = [1, 1, 1]} : vector<2x8x96xf32> to vector<2x8x8xf32>
    "tpu.trace_start"() <{level = 10 : i32, message = "bqd,bkd->bqk"}> : () -> ()
    %cst_21 = arith.constant dense<0.000000e+00> : vector<2x8x8xf32>
    %74 = tpu.matmul %71, %72, %cst_21 {dimension_numbers = #tpu.dot_dimension_numbers<[2], [2], [1], [1], [0, 0, 0, 1, 1, 1], [0], [0]>} : vector<2x8x8xf32>, vector<2x8x8xf32>, vector<2x8x8xf32> -> vector<2x8x8xf32>
    "tpu.trace_stop"() : () -> ()
    %cst_22 = arith.constant 0.353553385 : f32
    %75 = vector.broadcast %cst_22 : f32 to vector<2x8x8xf32>
    %76 = arith.mulf %74, %75 : vector<2x8x8xf32>
    %cst_23 = arith.constant dense<0xFF800000> : vector<2x8xf32>
    %77 = vector.multi_reduction <maximumf>, %76, %cst_23 [2] : vector<2x8x8xf32> to vector<2x8xf32>
    %78 = vector.shape_cast %77 : vector<2x8xf32> to vector<2x8x1xf32>
    %79 = vector.broadcast %78 : vector<2x8x1xf32> to vector<2x8x8xf32>
    %80 = arith.subf %76, %79 : vector<2x8x8xf32>
    %81 = math.exp %80 : vector<2x8x8xf32>
    %cst_24 = arith.constant dense<0.000000e+00> : vector<2x8xf32>
    %82 = vector.multi_reduction <add>, %81, %cst_24 [2] : vector<2x8x8xf32> to vector<2x8xf32>
    %83 = vector.shape_cast %82 : vector<2x8xf32> to vector<2x8x1xf32>
    %84 = tpu.reciprocal %83 {approx = true} : vector<2x8x1xf32> -> vector<2x8x1xf32>
    %85 = vector.broadcast %84 : vector<2x8x1xf32> to vector<2x8x8xf32>
    %86 = arith.mulf %81, %85 : vector<2x8x8xf32>
    "tpu.trace_start"() <{level = 10 : i32, message = "bqk,bkd->bqd"}> : () -> ()
    %cst_25 = arith.constant dense<0.000000e+00> : vector<2x8x8xf32>
    %87 = tpu.matmul %86, %73, %cst_25 {dimension_numbers = #tpu.dot_dimension_numbers<[2], [1], [1], [2], [0, 0, 0, 1, 1, 2], [0], [0]>} : vector<2x8x8xf32>, vector<2x8x8xf32>, vector<2x8x8xf32> -> vector<2x8x8xf32>
    "tpu.trace_stop"() : () -> ()
    %88 = tpu.concatenate %36, %53, %70, %87 in 2 : vector<2x8x8xf32>, vector<2x8x8xf32>, vector<2x8x8xf32>, vector<2x8x8xf32> -> vector<2x8x32xf32>
    %89 = vector.shape_cast %88 : vector<2x8x32xf32> to vector<16x32xf32>
    %cst_26 = arith.constant dense<0.000000e+00> : vector<16x32xf32>
    %90 = tpu.matmul %89, %3, %cst_26 {dimension_numbers = #tpu.dot_dimension_numbers<[1], [0], [0], [1], [0, 0, 1, 1], [], []>} : vector<16x32xf32>, vector<32x32xf32>, vector<16x32xf32> -> vector<16x32xf32>
    %91 = vector.broadcast %7 : vector<1x32xf32> to vector<16x32xf32>
    %92 = arith.addf %90, %91 : vector<16x32xf32>
    %93 = arith.addf %15, %92 : vector<16x32xf32>
    %cst_27 = arith.constant dense<0.000000e+00> : vector<16xf32>
    %94 = vector.multi_reduction <add>, %93, %cst_27 [1] : vector<16x32xf32> to vector<16xf32>
    %95 = vector.shape_cast %94 : vector<16xf32> to vector<16x1xf32>
    %cst_28 = arith.constant 3.200000e+01 : f32
    %96 = vector.broadcast %cst_28 : f32 to vector<16x1xf32>
    %97 = arith.divf %95, %96 : vector<16x1xf32>
    %98 = vector.broadcast %97 : vector<16x1xf32> to vector<16x32xf32>
    %99 = arith.subf %93, %98 : vector<16x32xf32>
    %100 = arith.mulf %99, %99 : vector<16x32xf32>
    %cst_29 = arith.constant dense<0.000000e+00> : vector<16xf32>
    %101 = vector.multi_reduction <add>, %100, %cst_29 [1] : vector<16x32xf32> to vector<16xf32>
    %102 = vector.shape_cast %101 : vector<16xf32> to vector<16x1xf32>
    %cst_30 = arith.constant 3.200000e+01 : f32
    %103 = vector.broadcast %cst_30 : f32 to vector<16x1xf32>
    %104 = arith.divf %102, %103 : vector<16x1xf32>
    %105 = vector.broadcast %97 : vector<16x1xf32> to vector<16x32xf32>
    %106 = arith.subf %93, %105 : vector<16x32xf32>
    %cst_31 = arith.constant 9.99999974E-6 : f32
    %107 = vector.broadcast %cst_31 : f32 to vector<16x1xf32>
    %108 = arith.addf %104, %107 : vector<16x1xf32>
    %109 = math.rsqrt %108 : vector<16x1xf32>
    %110 = vector.broadcast %109 : vector<16x1xf32> to vector<16x32xf32>
    %111 = arith.mulf %106, %110 : vector<16x32xf32>
    %112 = vector.broadcast %10 : vector<1x32xf32> to vector<16x32xf32>
    %113 = arith.mulf %111, %112 : vector<16x32xf32>
    %114 = vector.broadcast %11 : vector<1x32xf32> to vector<16x32xf32>
    %115 = arith.addf %113, %114 : vector<16x32xf32>
    %cst_32 = arith.constant dense<0.000000e+00> : vector<16x64xf32>
    %116 = tpu.matmul %115, %4, %cst_32 {dimension_numbers = #tpu.dot_dimension_numbers<[1], [0], [0], [1], [0, 0, 1, 1], [], []>} : vector<16x32xf32>, vector<32x64xf32>, vector<16x64xf32> -> vector<16x64xf32>
    %117 = vector.broadcast %8 : vector<1x64xf32> to vector<16x64xf32>
    %118 = arith.addf %116, %117 : vector<16x64xf32>
    %cst_33 = arith.constant 0.000000e+00 : f32
    %119 = vector.broadcast %cst_33 : f32 to vector<16x64xf32>
    %120 = arith.maximumf %118, %119 : vector<16x64xf32>
    %cst_34 = arith.constant dense<0.000000e+00> : vector<16x32xf32>
    %121 = tpu.matmul %120, %5, %cst_34 {dimension_numbers = #tpu.dot_dimension_numbers<[1], [0], [0], [1], [0, 0, 1, 1], [], []>} : vector<16x64xf32>, vector<64x32xf32>, vector<16x32xf32> -> vector<16x32xf32>
    %122 = vector.broadcast %9 : vector<1x32xf32> to vector<16x32xf32>
    %123 = arith.addf %121, %122 : vector<16x32xf32>
    %124 = arith.addf %115, %123 : vector<16x32xf32>
    %cst_35 = arith.constant dense<0.000000e+00> : vector<16xf32>
    %125 = vector.multi_reduction <add>, %124, %cst_35 [1] : vector<16x32xf32> to vector<16xf32>
    %126 = vector.shape_cast %125 : vector<16xf32> to vector<16x1xf32>
    %cst_36 = arith.constant 3.200000e+01 : f32
    %127 = vector.broadcast %cst_36 : f32 to vector<16x1xf32>
    %128 = arith.divf %126, %127 : vector<16x1xf32>
    %129 = vector.broadcast %128 : vector<16x1xf32> to vector<16x32xf32>
    %130 = arith.subf %124, %129 : vector<16x32xf32>
    %131 = arith.mulf %130, %130 : vector<16x32xf32>
    %cst_37 = arith.constant dense<0.000000e+00> : vector<16xf32>
    %132 = vector.multi_reduction <add>, %131, %cst_37 [1] : vector<16x32xf32> to vector<16xf32>
    %133 = vector.shape_cast %132 : vector<16xf32> to vector<16x1xf32>
    %cst_38 = arith.constant 3.200000e+01 : f32
    %134 = vector.broadcast %cst_38 : f32 to vector<16x1xf32>
    %135 = arith.divf %133, %134 : vector<16x1xf32>
    %136 = vector.broadcast %128 : vector<16x1xf32> to vector<16x32xf32>
    %137 = arith.subf %124, %136 : vector<16x32xf32>
    %cst_39 = arith.constant 9.99999974E-6 : f32
    %138 = vector.broadcast %cst_39 : f32 to vector<16x1xf32>
    %139 = arith.addf %135, %138 : vector<16x1xf32>
    %140 = math.rsqrt %139 : vector<16x1xf32>
    %141 = vector.broadcast %140 : vector<16x1xf32> to vector<16x32xf32>
    %142 = arith.mulf %137, %141 : vector<16x32xf32>
    %143 = vector.broadcast %12 : vector<1x32xf32> to vector<16x32xf32>
    %144 = arith.mulf %142, %143 : vector<16x32xf32>
    %145 = vector.broadcast %13 : vector<1x32xf32> to vector<16x32xf32>
    %146 = arith.addf %144, %145 : vector<16x32xf32>
    %cst_40 = arith.constant dense<0.000000e+00> : vector<16x96xf32>
    %147 = tpu.matmul %146, %2, %cst_40 {dimension_numbers = #tpu.dot_dimension_numbers<[1], [0], [0], [1], [0, 0, 1, 1], [], []>} : vector<16x32xf32>, vector<32x96xf32>, vector<16x96xf32> -> vector<16x96xf32>
    %148 = vector.broadcast %6 : vector<1x96xf32> to vector<16x96xf32>
    %149 = arith.addf %147, %148 : vector<16x96xf32>
    %150 = vector.shape_cast %149 : vector<16x96xf32> to vector<2x8x96xf32>
    %151 = vector.extract_strided_slice %150 {offsets = [0, 0, 0], sizes = [2, 8, 8], strides = [1, 1, 1]} : vector<2x8x96xf32> to vector<2x8x8xf32>
    %152 = vector.extract_strided_slice %150 {offsets = [0, 0, 32], sizes = [2, 8, 8], strides = [1, 1, 1]} : vector<2x8x96xf32> to vector<2x8x8xf32>
    %153 = vector.extract_strided_slice %150 {offsets = [0, 0, 64], sizes = [2, 8, 8], strides = [1, 1, 1]} : vector<2x8x96xf32> to vector<2x8x8xf32>
    "tpu.trace_start"() <{level = 10 : i32, message = "bqd,bkd->bqk"}> : () -> ()
    %cst_41 = arith.constant dense<0.000000e+00> : vector<2x8x8xf32>
    %154 = tpu.matmul %151, %152, %cst_41 {dimension_numbers = #tpu.dot_dimension_numbers<[2], [2], [1], [1], [0, 0, 0, 1, 1, 1], [0], [0]>} : vector<2x8x8xf32>, vector<2x8x8xf32>, vector<2x8x8xf32> -> vector<2x8x8xf32>
    "tpu.trace_stop"() : () -> ()
    %cst_42 = arith.constant 0.353553385 : f32
    %155 = vector.broadcast %cst_42 : f32 to vector<2x8x8xf32>
    %156 = arith.mulf %154, %155 : vector<2x8x8xf32>
    %cst_43 = arith.constant dense<0xFF800000> : vector<2x8xf32>
    %157 = vector.multi_reduction <maximumf>, %156, %cst_43 [2] : vector<2x8x8xf32> to vector<2x8xf32>
    %158 = vector.shape_cast %157 : vector<2x8xf32> to vector<2x8x1xf32>
    %159 = vector.broadcast %158 : vector<2x8x1xf32> to vector<2x8x8xf32>
    %160 = arith.subf %156, %159 : vector<2x8x8xf32>
    %161 = math.exp %160 : vector<2x8x8xf32>
    %cst_44 = arith.constant dense<0.000000e+00> : vector<2x8xf32>
    %162 = vector.multi_reduction <add>, %161, %cst_44 [2] : vector<2x8x8xf32> to vector<2x8xf32>
    %163 = vector.shape_cast %162 : vector<2x8xf32> to vector<2x8x1xf32>
    %164 = tpu.reciprocal %163 {approx = true} : vector<2x8x1xf32> -> vector<2x8x1xf32>
    %165 = vector.broadcast %164 : vector<2x8x1xf32> to vector<2x8x8xf32>
    %166 = arith.mulf %161, %165 : vector<2x8x8xf32>
    "tpu.trace_start"() <{level = 10 : i32, message = "bqk,bkd->bqd"}> : () -> ()
    %cst_45 = arith.constant dense<0.000000e+00> : vector<2x8x8xf32>
    %167 = tpu.matmul %166, %153, %cst_45 {dimension_numbers = #tpu.dot_dimension_numbers<[2], [1], [1], [2], [0, 0, 0, 1, 1, 2], [0], [0]>} : vector<2x8x8xf32>, vector<2x8x8xf32>, vector<2x8x8xf32> -> vector<2x8x8xf32>
    "tpu.trace_stop"() : () -> ()
    %168 = vector.extract_strided_slice %150 {offsets = [0, 0, 8], sizes = [2, 8, 8], strides = [1, 1, 1]} : vector<2x8x96xf32> to vector<2x8x8xf32>
    %169 = vector.extract_strided_slice %150 {offsets = [0, 0, 40], sizes = [2, 8, 8], strides = [1, 1, 1]} : vector<2x8x96xf32> to vector<2x8x8xf32>
    %170 = vector.extract_strided_slice %150 {offsets = [0, 0, 72], sizes = [2, 8, 8], strides = [1, 1, 1]} : vector<2x8x96xf32> to vector<2x8x8xf32>
    "tpu.trace_start"() <{level = 10 : i32, message = "bqd,bkd->bqk"}> : () -> ()
    %cst_46 = arith.constant dense<0.000000e+00> : vector<2x8x8xf32>
    %171 = tpu.matmul %168, %169, %cst_46 {dimension_numbers = #tpu.dot_dimension_numbers<[2], [2], [1], [1], [0, 0, 0, 1, 1, 1], [0], [0]>} : vector<2x8x8xf32>, vector<2x8x8xf32>, vector<2x8x8xf32> -> vector<2x8x8xf32>
    "tpu.trace_stop"() : () -> ()
    %cst_47 = arith.constant 0.353553385 : f32
    %172 = vector.broadcast %cst_47 : f32 to vector<2x8x8xf32>
    %173 = arith.mulf %171, %172 : vector<2x8x8xf32>
    %cst_48 = arith.constant dense<0xFF800000> : vector<2x8xf32>
    %174 = vector.multi_reduction <maximumf>, %173, %cst_48 [2] : vector<2x8x8xf32> to vector<2x8xf32>
    %175 = vector.shape_cast %174 : vector<2x8xf32> to vector<2x8x1xf32>
    %176 = vector.broadcast %175 : vector<2x8x1xf32> to vector<2x8x8xf32>
    %177 = arith.subf %173, %176 : vector<2x8x8xf32>
    %178 = math.exp %177 : vector<2x8x8xf32>
    %cst_49 = arith.constant dense<0.000000e+00> : vector<2x8xf32>
    %179 = vector.multi_reduction <add>, %178, %cst_49 [2] : vector<2x8x8xf32> to vector<2x8xf32>
    %180 = vector.shape_cast %179 : vector<2x8xf32> to vector<2x8x1xf32>
    %181 = tpu.reciprocal %180 {approx = true} : vector<2x8x1xf32> -> vector<2x8x1xf32>
    %182 = vector.broadcast %181 : vector<2x8x1xf32> to vector<2x8x8xf32>
    %183 = arith.mulf %178, %182 : vector<2x8x8xf32>
    "tpu.trace_start"() <{level = 10 : i32, message = "bqk,bkd->bqd"}> : () -> ()
    %cst_50 = arith.constant dense<0.000000e+00> : vector<2x8x8xf32>
    %184 = tpu.matmul %183, %170, %cst_50 {dimension_numbers = #tpu.dot_dimension_numbers<[2], [1], [1], [2], [0, 0, 0, 1, 1, 2], [0], [0]>} : vector<2x8x8xf32>, vector<2x8x8xf32>, vector<2x8x8xf32> -> vector<2x8x8xf32>
    "tpu.trace_stop"() : () -> ()
    %185 = vector.extract_strided_slice %150 {offsets = [0, 0, 16], sizes = [2, 8, 8], strides = [1, 1, 1]} : vector<2x8x96xf32> to vector<2x8x8xf32>
    %186 = vector.extract_strided_slice %150 {offsets = [0, 0, 48], sizes = [2, 8, 8], strides = [1, 1, 1]} : vector<2x8x96xf32> to vector<2x8x8xf32>
    %187 = vector.extract_strided_slice %150 {offsets = [0, 0, 80], sizes = [2, 8, 8], strides = [1, 1, 1]} : vector<2x8x96xf32> to vector<2x8x8xf32>
    "tpu.trace_start"() <{level = 10 : i32, message = "bqd,bkd->bqk"}> : () -> ()
    %cst_51 = arith.constant dense<0.000000e+00> : vector<2x8x8xf32>
    %188 = tpu.matmul %185, %186, %cst_51 {dimension_numbers = #tpu.dot_dimension_numbers<[2], [2], [1], [1], [0, 0, 0, 1, 1, 1], [0], [0]>} : vector<2x8x8xf32>, vector<2x8x8xf32>, vector<2x8x8xf32> -> vector<2x8x8xf32>
    "tpu.trace_stop"() : () -> ()
    %cst_52 = arith.constant 0.353553385 : f32
    %189 = vector.broadcast %cst_52 : f32 to vector<2x8x8xf32>
    %190 = arith.mulf %188, %189 : vector<2x8x8xf32>
    %cst_53 = arith.constant dense<0xFF800000> : vector<2x8xf32>
    %191 = vector.multi_reduction <maximumf>, %190, %cst_53 [2] : vector<2x8x8xf32> to vector<2x8xf32>
    %192 = vector.shape_cast %191 : vector<2x8xf32> to vector<2x8x1xf32>
    %193 = vector.broadcast %192 : vector<2x8x1xf32> to vector<2x8x8xf32>
    %194 = arith.subf %190, %193 : vector<2x8x8xf32>
    %195 = math.exp %194 : vector<2x8x8xf32>
    %cst_54 = arith.constant dense<0.000000e+00> : vector<2x8xf32>
    %196 = vector.multi_reduction <add>, %195, %cst_54 [2] : vector<2x8x8xf32> to vector<2x8xf32>
    %197 = vector.shape_cast %196 : vector<2x8xf32> to vector<2x8x1xf32>
    %198 = tpu.reciprocal %197 {approx = true} : vector<2x8x1xf32> -> vector<2x8x1xf32>
    %199 = vector.broadcast %198 : vector<2x8x1xf32> to vector<2x8x8xf32>
    %200 = arith.mulf %195, %199 : vector<2x8x8xf32>
    "tpu.trace_start"() <{level = 10 : i32, message = "bqk,bkd->bqd"}> : () -> ()
    %cst_55 = arith.constant dense<0.000000e+00> : vector<2x8x8xf32>
    %201 = tpu.matmul %200, %187, %cst_55 {dimension_numbers = #tpu.dot_dimension_numbers<[2], [1], [1], [2], [0, 0, 0, 1, 1, 2], [0], [0]>} : vector<2x8x8xf32>, vector<2x8x8xf32>, vector<2x8x8xf32> -> vector<2x8x8xf32>
    "tpu.trace_stop"() : () -> ()
    %202 = vector.extract_strided_slice %150 {offsets = [0, 0, 24], sizes = [2, 8, 8], strides = [1, 1, 1]} : vector<2x8x96xf32> to vector<2x8x8xf32>
    %203 = vector.extract_strided_slice %150 {offsets = [0, 0, 56], sizes = [2, 8, 8], strides = [1, 1, 1]} : vector<2x8x96xf32> to vector<2x8x8xf32>
    %204 = vector.extract_strided_slice %150 {offsets = [0, 0, 88], sizes = [2, 8, 8], strides = [1, 1, 1]} : vector<2x8x96xf32> to vector<2x8x8xf32>
    "tpu.trace_start"() <{level = 10 : i32, message = "bqd,bkd->bqk"}> : () -> ()
    %cst_56 = arith.constant dense<0.000000e+00> : vector<2x8x8xf32>
    %205 = tpu.matmul %202, %203, %cst_56 {dimension_numbers = #tpu.dot_dimension_numbers<[2], [2], [1], [1], [0, 0, 0, 1, 1, 1], [0], [0]>} : vector<2x8x8xf32>, vector<2x8x8xf32>, vector<2x8x8xf32> -> vector<2x8x8xf32>
    "tpu.trace_stop"() : () -> ()
    %cst_57 = arith.constant 0.353553385 : f32
    %206 = vector.broadcast %cst_57 : f32 to vector<2x8x8xf32>
    %207 = arith.mulf %205, %206 : vector<2x8x8xf32>
    %cst_58 = arith.constant dense<0xFF800000> : vector<2x8xf32>
    %208 = vector.multi_reduction <maximumf>, %207, %cst_58 [2] : vector<2x8x8xf32> to vector<2x8xf32>
    %209 = vector.shape_cast %208 : vector<2x8xf32> to vector<2x8x1xf32>
    %210 = vector.broadcast %209 : vector<2x8x1xf32> to vector<2x8x8xf32>
    %211 = arith.subf %207, %210 : vector<2x8x8xf32>
    %212 = math.exp %211 : vector<2x8x8xf32>
    %cst_59 = arith.constant dense<0.000000e+00> : vector<2x8xf32>
    %213 = vector.multi_reduction <add>, %212, %cst_59 [2] : vector<2x8x8xf32> to vector<2x8xf32>
    %214 = vector.shape_cast %213 : vector<2x8xf32> to vector<2x8x1xf32>
    %215 = tpu.reciprocal %214 {approx = true} : vector<2x8x1xf32> -> vector<2x8x1xf32>
    %216 = vector.broadcast %215 : vector<2x8x1xf32> to vector<2x8x8xf32>
    %217 = arith.mulf %212, %216 : vector<2x8x8xf32>
    "tpu.trace_start"() <{level = 10 : i32, message = "bqk,bkd->bqd"}> : () -> ()
    %cst_60 = arith.constant dense<0.000000e+00> : vector<2x8x8xf32>
    %218 = tpu.matmul %217, %204, %cst_60 {dimension_numbers = #tpu.dot_dimension_numbers<[2], [1], [1], [2], [0, 0, 0, 1, 1, 2], [0], [0]>} : vector<2x8x8xf32>, vector<2x8x8xf32>, vector<2x8x8xf32> -> vector<2x8x8xf32>
    "tpu.trace_stop"() : () -> ()
    %219 = tpu.concatenate %167, %184, %201, %218 in 2 : vector<2x8x8xf32>, vector<2x8x8xf32>, vector<2x8x8xf32>, vector<2x8x8xf32> -> vector<2x8x32xf32>
    %220 = vector.shape_cast %219 : vector<2x8x32xf32> to vector<16x32xf32>
    %cst_61 = arith.constant dense<0.000000e+00> : vector<16x32xf32>
    %221 = tpu.matmul %220, %3, %cst_61 {dimension_numbers = #tpu.dot_dimension_numbers<[1], [0], [0], [1], [0, 0, 1, 1], [], []>} : vector<16x32xf32>, vector<32x32xf32>, vector<16x32xf32> -> vector<16x32xf32>
    %222 = vector.broadcast %7 : vector<1x32xf32> to vector<16x32xf32>
    %223 = arith.addf %221, %222 : vector<16x32xf32>
    %224 = arith.addf %146, %223 : vector<16x32xf32>
    %cst_62 = arith.constant dense<0.000000e+00> : vector<16xf32>
    %225 = vector.multi_reduction <add>, %224, %cst_62 [1] : vector<16x32xf32> to vector<16xf32>
    %226 = vector.shape_cast %225 : vector<16xf32> to vector<16x1xf32>
    %cst_63 = arith.constant 3.200000e+01 : f32
    %227 = vector.broadcast %cst_63 : f32 to vector<16x1xf32>
    %228 = arith.divf %226, %227 : vector<16x1xf32>
    %229 = vector.broadcast %228 : vector<16x1xf32> to vector<16x32xf32>
    %230 = arith.subf %224, %229 : vector<16x32xf32>
    %231 = arith.mulf %230, %230 : vector<16x32xf32>
    %cst_64 = arith.constant dense<0.000000e+00> : vector<16xf32>
    %232 = vector.multi_reduction <add>, %231, %cst_64 [1] : vector<16x32xf32> to vector<16xf32>
    %233 = vector.shape_cast %232 : vector<16xf32> to vector<16x1xf32>
    %cst_65 = arith.constant 3.200000e+01 : f32
    %234 = vector.broadcast %cst_65 : f32 to vector<16x1xf32>
    %235 = arith.divf %233, %234 : vector<16x1xf32>
    %236 = vector.broadcast %228 : vector<16x1xf32> to vector<16x32xf32>
    %237 = arith.subf %224, %236 : vector<16x32xf32>
    %cst_66 = arith.constant 9.99999974E-6 : f32
    %238 = vector.broadcast %cst_66 : f32 to vector<16x1xf32>
    %239 = arith.addf %235, %238 : vector<16x1xf32>
    %240 = math.rsqrt %239 : vector<16x1xf32>
    %241 = vector.broadcast %240 : vector<16x1xf32> to vector<16x32xf32>
    %242 = arith.mulf %237, %241 : vector<16x32xf32>
    %243 = vector.broadcast %10 : vector<1x32xf32> to vector<16x32xf32>
    %244 = arith.mulf %242, %243 : vector<16x32xf32>
    %245 = vector.broadcast %11 : vector<1x32xf32> to vector<16x32xf32>
    %246 = arith.addf %244, %245 : vector<16x32xf32>
    %cst_67 = arith.constant dense<0.000000e+00> : vector<16x64xf32>
    %247 = tpu.matmul %246, %4, %cst_67 {dimension_numbers = #tpu.dot_dimension_numbers<[1], [0], [0], [1], [0, 0, 1, 1], [], []>} : vector<16x32xf32>, vector<32x64xf32>, vector<16x64xf32> -> vector<16x64xf32>
    %248 = vector.broadcast %8 : vector<1x64xf32> to vector<16x64xf32>
    %249 = arith.addf %247, %248 : vector<16x64xf32>
    %cst_68 = arith.constant 0.000000e+00 : f32
    %250 = vector.broadcast %cst_68 : f32 to vector<16x64xf32>
    %251 = arith.maximumf %249, %250 : vector<16x64xf32>
    %cst_69 = arith.constant dense<0.000000e+00> : vector<16x32xf32>
    %252 = tpu.matmul %251, %5, %cst_69 {dimension_numbers = #tpu.dot_dimension_numbers<[1], [0], [0], [1], [0, 0, 1, 1], [], []>} : vector<16x64xf32>, vector<64x32xf32>, vector<16x32xf32> -> vector<16x32xf32>
    %253 = vector.broadcast %9 : vector<1x32xf32> to vector<16x32xf32>
    %254 = arith.addf %252, %253 : vector<16x32xf32>
    %255 = arith.addf %246, %254 : vector<16x32xf32>
    %cst_70 = arith.constant dense<0.000000e+00> : vector<16xf32>
    %256 = vector.multi_reduction <add>, %255, %cst_70 [1] : vector<16x32xf32> to vector<16xf32>
    %257 = vector.shape_cast %256 : vector<16xf32> to vector<16x1xf32>
    %cst_71 = arith.constant 3.200000e+01 : f32
    %258 = vector.broadcast %cst_71 : f32 to vector<16x1xf32>
    %259 = arith.divf %257, %258 : vector<16x1xf32>
    %260 = vector.broadcast %259 : vector<16x1xf32> to vector<16x32xf32>
    %261 = arith.subf %255, %260 : vector<16x32xf32>
    %262 = arith.mulf %261, %261 : vector<16x32xf32>
    %cst_72 = arith.constant dense<0.000000e+00> : vector<16xf32>
    %263 = vector.multi_reduction <add>, %262, %cst_72 [1] : vector<16x32xf32> to vector<16xf32>
    %264 = vector.shape_cast %263 : vector<16xf32> to vector<16x1xf32>
    %cst_73 = arith.constant 3.200000e+01 : f32
    %265 = vector.broadcast %cst_73 : f32 to vector<16x1xf32>
    %266 = arith.divf %264, %265 : vector<16x1xf32>
    %267 = vector.broadcast %259 : vector<16x1xf32> to vector<16x32xf32>
    %268 = arith.subf %255, %267 : vector<16x32xf32>
    %cst_74 = arith.constant 9.99999974E-6 : f32
    %269 = vector.broadcast %cst_74 : f32 to vector<16x1xf32>
    %270 = arith.addf %266, %269 : vector<16x1xf32>
    %271 = math.rsqrt %270 : vector<16x1xf32>
    %272 = vector.broadcast %271 : vector<16x1xf32> to vector<16x32xf32>
    %273 = arith.mulf %268, %272 : vector<16x32xf32>
    %274 = vector.broadcast %12 : vector<1x32xf32> to vector<16x32xf32>
    %275 = arith.mulf %273, %274 : vector<16x32xf32>
    %276 = vector.broadcast %13 : vector<1x32xf32> to vector<16x32xf32>
    %277 = arith.addf %275, %276 : vector<16x32xf32>
    %278 = vector.shape_cast %277 : vector<16x32xf32> to vector<2x8x32xf32>
    %c0_75 = arith.constant 0 : index
    %c0_76 = arith.constant 0 : index
    %c0_77 = arith.constant 0 : index
    %279 = vector.load %arg4[%c0_75, %c0_76, %c0_77] : memref<2x8x32xf32, #tpu.memory_space<vmem>>, vector<2x8x32xf32>
    tpu.vector_store %arg4[%c0_75, %c0_76, %c0_77], %278 {strides = array<i32>} : memref<2x8x32xf32, #tpu.memory_space<vmem>>, vector<2x8x32xf32>,
    return
  }
  func.func @transform_0(%arg0: i32) -> (i32, i32, i32) {
    %c0_i32 = arith.constant 0 : i32
    %c0_i32_0 = arith.constant 0 : i32
    %c0_i32_1 = arith.constant 0 : i32
    %c0_i32_2 = arith.constant 0 : i32
    return %c0_i32, %c0_i32_0, %c0_i32_1 : i32, i32, i32
  }
  func.func @transform_1(%arg0: i32) -> (i32, i32) {
    %c0_i32 = arith.constant 0 : i32
    %c0_i32_0 = arith.constant 0 : i32
    %c0_i32_1 = arith.constant 0 : i32
    return %c0_i32, %c0_i32_0 : i32, i32
  }
  func.func @transform_2(%arg0: i32) -> (i32, i32) {
    %c0_i32 = arith.constant 0 : i32
    %c0_i32_0 = arith.constant 0 : i32
    %c0_i32_1 = arith.constant 0 : i32
    return %c0_i32, %c0_i32_0 : i32, i32
  }
  func.func @transform_3(%arg0: i32) -> (i32, i32, i32) {
    %c0_i32 = arith.constant 0 : i32
    %c0_i32_0 = arith.constant 0 : i32
    %c0_i32_1 = arith.constant 0 : i32
    %c0_i32_2 = arith.constant 0 : i32
    return %c0_i32, %c0_i32_0, %c0_i32_1 : i32, i32, i32
  }
}

</mosaic_0001>

<bundles_post_ra>
// kernel: transformer_encoder.1
= control target key start
LH: loop header
LB: loop body
LE: loop exit
PB: predicated region body
PF: predicated region fallthrough
CT: control target
= control target key end

     0   :  { %8 = vsyncpa [#allocation3], 0  ;;  %s4997_s0 = inlined_call_operand.hbm [shape: f32[2,8,32], index: 0, kind: input, shape index: {}]   ;;  %s4998_s1 = inlined_call_operand.hbm [shape: f32[128,128], index: 1, kind: input, shape index: {}]   ;;  %s4999_s2 = inlined_call_operand.hbm [shape: f32[8,128], index: 2, kind: input, shape index: {}]   ;;  %s5000_s3 = inlined_call_operand.hbm [shape: f32[2,8,32], index: 3, kind: output, shape index: {}]  }
   0x1   :  { %9 = vsyncpa [#allocation6], 0 }
   0x2   :  { %10 = vsyncpa [#allocation4], 0  ;;  %s4371_s12 = smov [#allocation5]   ;;  %s4372_s14 = smov [#allocation2]  }
   0x3   :  { %s28_s13 = sshll.u32 %s4371_s12, 4  ;;  %s16_s15 = sshll.u32 %s4372_s14, 4  ;;  %s29_s13 = int_to_ptr.vmem [resolvable:$true] %s28_s13  ;;  %s4413_s15 = int_to_ptr.vmem [resolvable:$true] %s16_s15 }
   0x4   :  { %s4277_s18 = scalar_lea.hbm %s4998_s1, 2048 }
   0x5   :  { %p4278_p0 = scmp.ne.s32.totalorder %s4998_s1, %s4277_s18  ;;  %p4281_p1 = scmp.lt.u32.totalorder %s4277_s18, %s4998_s1 }
   0x7   :  { %p4283_p2 = pnand %p4281_p1, %p4278_p0 }
   0x9   :  { %4286 = shalt.err (!%p4283_p2)
}
   0xa   :  { %s4287_s23 = scalar_lea.vmem %s29_s13, 2048  ;;  %p4292_p4 = scmp.lt.s32.totalorder %s29_s13, %s29_s13 }
   0xb   :  { %p4288_p3 = scmp.ne.s32.totalorder %s29_s13, %s4287_s23  ;;  %p4293_p5 = scmp.lt.s32.totalorder %s4287_s23, %s4287_s23 }
   0xd   :  { %p4294_p6 = por %p4293_p5, %p4292_p4 }
   0xf   :  { %p4295_p7 = pnand %p4294_p6, %p4288_p3 }
  0x11   :  { %4298 = shalt.err (!%p4295_p7)
}
  0x12   :  { %s4373_s24 = smov 128   ;;  %s4374_s25 = smov 8  }
  0x13   :  { %34 = dma.hbm_to_vmem [thread:$0]  %s4998_s1, 2048, %s29_s13, [#allocation6], %s4373_s24, %s4373_s24, %s4374_s25  }
  0x14   :  { %s4299_s30 = scalar_lea.hbm %s4997_s0, 256 }
  0x15   :  { %p4300_p8 = scmp.ne.s32.totalorder %s4997_s0, %s4299_s30  ;;  %p4303_p9 = scmp.lt.u32.totalorder %s4299_s30, %s4997_s0 }
  0x17   :  { %p4305_p10 = pnand %p4303_p9, %p4300_p8 }
  0x19   :  { %4308 = shalt.err (!%p4305_p10)
}
  0x1a   :  { %s4309_s8 = scalar_lea.vmem %s4413_s15, 256  ;;  %p4314_p12 = scmp.lt.s32.totalorder %s4413_s15, %s4413_s15 }
  0x1b   :  { %p4310_p11 = scmp.ne.s32.totalorder %s4413_s15, %s4309_s8  ;;  %p4315_p13 = scmp.lt.s32.totalorder %s4309_s8, %s4309_s8 }
  0x1d   :  { %p4316_p0 = por %p4315_p13, %p4314_p12 }
  0x1f   :  { %p4317_p1 = pnand %p4316_p0, %p4310_p11 }
  0x21   :  { %4320 = shalt.err (!%p4317_p1)
}
  0x22   :  { %22 = dma.hbm_to_vmem [thread:$0]  %s4997_s0, 256, %s4413_s15, [#allocation3], %s4373_s24, %s4373_s24, %s4374_s25  }
  0x23   :  { %s4375_s10 = smov [#allocation7]   ;;  %s4321_s14 = scalar_lea.hbm %s4999_s2, 128 }
  0x24   :  { %s41_s11 = sshll.u32 %s4375_s10, 4  ;;  %p4322_p2 = scmp.ne.s32.totalorder %s4999_s2, %s4321_s14  ;;  %s42_s11 = int_to_ptr.vmem [resolvable:$true] %s41_s11 }
  0x25   :  { %p4325_p3 = scmp.lt.u32.totalorder %s4321_s14, %s4999_s2 }
  0x27   :  { %p4327_p4 = pnand %p4325_p3, %p4322_p2 }
  0x29   :  { %4330 = shalt.err (!%p4327_p4)
}
  0x2a   :  { %s4331_s20 = scalar_lea.vmem %s42_s11, 128  ;;  %p4336_p6 = scmp.lt.s32.totalorder %s42_s11, %s42_s11 }
  0x2b   :  { %p4332_p5 = scmp.ne.s32.totalorder %s42_s11, %s4331_s20  ;;  %p4337_p7 = scmp.lt.s32.totalorder %s4331_s20, %s4331_s20 }
  0x2d   :  { %p4338_p8 = por %p4337_p7, %p4336_p6 }
  0x2f   :  { %p4339_p9 = pnand %p4338_p8, %p4332_p5 }
  0x31   :  { %4342 = shalt.err (!%p4339_p9)
}
  0x32   :  { %44 = dma.hbm_to_vmem [thread:$0]  %s4999_s2, 128, %s42_s11, [#allocation6]  }
  0x33   :  { %4365 = dma.done.wait [#allocation3], 256  }
  0x34   :  { %4366 = vsyncadd [#allocation3], 4294967040 }
  0x35   :  { %4367 = dma.done.wait [#allocation6], 2176  }
  0x36   :  { %4368 = vsyncadd [#allocation6], 4294965120  ;;  %vm77_vm0 = vcmask 261120   ;;  %v4462_v0 = vld [vmem:[#allocation5] sm:$0xff]  ;;  %v4464_v1 = vld [vmem:[#allocation5 + $0x8] sm:$0xff]  ;;  %v4376_v8 = vmov 0.0   ;;  %v73_v9 = vlaneseq }
  0x37   :  { %v4466_v2 = vld [vmem:[#allocation5 + $0x10] sm:$0xff]  ;;  %v4470_v3 = vpack.c.bf16 %v4464_v1, %v4462_v0  ;;  %v4472_v4 = vld [vmem:[#allocation5 + $0x18] sm:$0xff]  ;;  %3842 = vmatprep.subr.mxu0 %v4376_v8  ;;  %vm4377_vm1 = vmmov 0   ;;  %v4499_v12 = vld [vmem:[#allocation7] sm:$0xff]  ;;  %s4378_s2 = smov 96   ;;  %vm162_vm2 = vcmask 64512  }
  0x38   :  { %v4474_v5 = vld [vmem:[#allocation2] sm:$0xff]  ;;  %v4478_v6 = vpack.c.bf16 %v4472_v4, %v4466_v2  ;;  %v4486_v7 = vld [vmem:[#allocation2 + $0x8] sm:$0xff]  ;;  %v4492_v10 = vshrl.u32 %v73_v9, 7  ;;  %3844 = vmatprep.mubr.msk.f32.mxu0 %vm4377_vm1, %v4376_v8  ;;  %s4379_s21 = smov 64   ;;  %s4380_s22 = smov 88   ;;  %vm1515_vm3 = vcmask 195584  }
  0x39   :  { %3829 = vmatprep.mubr.msk.f32.mxu1 %vm77_vm0, %v4474_v5  ;;  %4086 = vmatprep.subr.bf16.mxu1 %v4470_v3  ;;  %s4381_s23 = smov 120   ;;  %s4382_s26 = smov 56   ;;  %vm1512_vm4 = vcmask 130048   ;;  %vm1750_vm5 = vcmask 523264  }
  0x3a   :  { %4088 = vmatpush3.bf16.msra.mxu1 %v4470_v3  ;;  %v75_v11 = vsub.s32 0, %v4492_v10  ;;  %s4383_s27 = smov 80   ;;  %s4384_s28 = smov 112  }
  0x3b   :  { %4090 = vmatprep.subr.bf16.mxu1 %v4478_v6  ;;  %s4385_s29 = smov 48   ;;  %s4386_s30 = smov 72  }
  0x3c   :  { %v4502_v13 = vrot.slane %v4499_v12, %v75_v11  ;;  %s4387_s4 = smov 104   ;;  %s4388_s5 = smov 40  }
  0x3d   :  { %s4389_s6 = smov 32   ;;  %s4390_s7 = smov 16  }
  0x3e   :  { %4092 = vmatpush3.bf16.msra.mxu1 %v4478_v6  ;;  %s4391_s8 = smov 24   ;;  %s4392_s1 = smov [#allocation8]  }
  0x3f   :  { %3832 = vmatprep.subr.mxu1 %v4376_v8  ;;  %s3624_s9 = sshll.u32 %s4392_s1, 4  ;;  %s3625_s9 = int_to_ptr.vmem [resolvable:$true] %s3624_s9 }
  0x40   :  { %s4343_s10 = scalar_lea.vmem %s3625_s9, 256  ;;  %p4348_p11 = scmp.lt.s32.totalorder %s3625_s9, %s3625_s9 }
  0x41   :  { %3830 = vmatmul.mubr.msk.f32.vlgmr.msra.gmra.mrb[0].mxu1 %vm77_vm0, %v4486_v7  ;;  %p4344_p10 = scmp.ne.s32.totalorder %s3625_s9, %s4343_s10  ;;  %p4349_p12 = scmp.lt.s32.totalorder %s4343_s10, %s4343_s10 }
  0x42   :  { %3834 = vmatprep.mubr.msk.f32.mxu1 %vm4377_vm1, %v4376_v8 }
  0x43   :  { %p4350_p13 = por %p4349_p12, %p4348_p11 }
  0x45   :  { %p4351_p0 = pnand %p4350_p13, %p4344_p10 }
 0x114   :  { %v3831_v14 = vpop.f32.mrb[0].mxu1 }
 0x115   :  { %v150_v15 = vpop.f32.mrb[1].mxu1  ;;  %v4510_v17 = vadd.f32 %v3831_v14, %v4502_v13 }
 0x116   :  { %v4505_v16 = vadd.f32 %v150_v15, %v4502_v13 }
 0x118   :  { %160 = vrot.lane.b32.xlu0 %v4505_v16, %s4378_s2 }
 0x11c   :  { %238 = vrot.lane.b32.xlu0 %v4510_v17, %s4378_s2 }
 0x18a   :  { %v161_v18 = vpop.permute.xlu0 %160 }
 0x18b   :  { %3833 = vmatpush3.xpose.msk.msra.mxu1 %vm162_vm2, %v161_v18 }
 0x18c   :  { %3837 = vmatprep.subr.mxu1 %v4376_v8 }
 0x18e   :  { %3835 = vmatmul.mubr.msk.f32.vlgmr.msra.gmra.mrb[2].mxu1 %vm162_vm2, %v4505_v16  ;;  %v239_v19 = vpop.permute.xlu0 %238 }
 0x18f   :  { %3838 = vmatpush3.xpose.msk.msra.mxu1 %vm162_vm2, %v239_v19  ;;  %3839 = vmatprep.mubr.msk.f32.mxu1 %vm4377_vm1, %v4376_v8 }
 0x190   :  { %3847 = vmatprep.subr.mxu1 %v4376_v8 }
 0x192   :  { %3840 = vmatmul.mubr.msk.f32.vlgmr.msra.gmra.mrb[4].mxu1 %vm162_vm2, %v4510_v17 }
 0x193   :  { %3849 = vmatprep.mubr.msk.f32.mxu1 %vm4377_vm1, %v4376_v8 }
 0x261   :  { %v233_v20 = vpop.f32.mrb[2].mxu1 }
 0x262   :  { %v314_v21 = vmul.f32 0.35355338, %v233_v20  ;;  %v3836_v22 = vpop.f32.mrb[3].mxu1 }
 0x264   :  { %v316_v23 = vsel %vm162_vm2, %v314_v21, -inf }
 0x265   :  { %317 = vmax.xlane.f32.xlu1 %v316_v23  ;;  %v310_v24 = vpop.f32.mrb[4].mxu1 }
 0x266   :  { %v315_v25 = vmul.f32 0.35355338, %v310_v24  ;;  %v3841_v26 = vpop.f32.mrb[5].mxu1 }
 0x268   :  { %v319_v27 = vsel %vm162_vm2, %v315_v25, -inf }
 0x269   :  { %320 = vmax.xlane.f32.xlu1 %v319_v27 }
 0x27a   :  { %338 = vrot.lane.b32.xlu1 %v4505_v16, %s4379_s21 }
 0x27e   :  { %414 = vrot.lane.b32.xlu1 %v4510_v17, %s4379_s21 }
 0x282   :  { %492 = vrot.lane.b32.xlu1 %v4505_v16, %s4380_s22 }
 0x286   :  { %570 = vrot.lane.b32.xlu1 %v4510_v17, %s4380_s22 }
 0x2f2   :  { %v318_v28 = vpop.xlane.xlu1 %317 }
 0x2f3   :  { %v322_v29 = vsub.f32 %v314_v21, %v318_v28 }
 0x2f5   :  { %v324_v30 = vmul.f32 1.442695, %v322_v29 }
 0x2f6   :  { %v321_v31 = vpop.xlane.xlu1 %320 }
 0x2f7   :  { %4197 = vpow2.f32 %v324_v30  ;;  %v323_v32 = vsub.f32 %v315_v25, %v321_v31 }
 0x2f9   :  { %v326_v33 = vmul.f32 1.442695, %v323_v32 }
 0x2fa   :  { %v339_v34 = vpop.permute.xlu1 %338 }
 0x2fb   :  { %4199 = vpow2.f32 %v326_v33  ;;  %3843 = vmatpush3.msra.mxu0 %v339_v34 }
 0x2fc   :  { %3852 = vmatprep.subr.mxu0 %v4376_v8 }
 0x2fe   :  { %v415_v35 = vpop.permute.xlu1 %414 }
 0x2ff   :  { %3848 = vmatpush3.msra.mxu1 %v415_v35 }
 0x300   :  { %3857 = vmatprep.subr.mxu1 %v4376_v8 }
 0x301   :  { %v4198_v36 = vpop.eup %4197 }
 0x302   :  { %v328_v37 = vsel %vm162_vm2, %v4198_v36, 0.0  ;;  %v493_v40 = vpop.permute.xlu1 %492 }
 0x303   :  { %329 = vadd.xlane.f32.xlu0 %v328_v37 }
 0x305   :  { %v4200_v38 = vpop.eup %4199 }
 0x306   :  { %v331_v39 = vsel %vm162_vm2, %v4200_v38, 0.0  ;;  %v571_v41 = vpop.permute.xlu1 %570 }
 0x307   :  { %332 = vadd.xlane.f32.xlu1 %v331_v39 }
 0x318   :  { %568 = vrot.lane.b32.xlu1 %v4510_v17, %s4381_s23 }
 0x319   :  { %490 = vrot.lane.b32.xlu0 %v4505_v16, %s4381_s23 }
 0x390   :  { %v330_v42 = vpop.xlane.xlu0 %329 }
 0x391   :  { %4201 = vrcp.f32 %v330_v42 }
 0x394   :  { %v333_v43 = vpop.xlane.xlu1 %332  ;;  %v491_v48 = vpop.permute.xlu0 %490 }
 0x395   :  { %4203 = vrcp.f32 %v333_v43 }
 0x398   :  { %v569_v49 = vpop.permute.xlu1 %568 }
 0x39b   :  { %v4202_v44 = vpop.eup %4201 }
 0x39c   :  { %v336_v45 = vmul.f32 %v4202_v44, %v4198_v36 }
 0x39e   :  { %3845 = vmatmul.mubr.msk.f32.vlgmr.msra.gmra.mrb[0].mxu0 %vm162_vm2, %v336_v45 }
 0x39f   :  { %v4204_v46 = vpop.eup %4203  ;;  %3853 = vmatpush3.xpose.msk.msra.mxu0 %vm162_vm2, %v493_v40  ;;  %3854 = vmatprep.mubr.msk.f32.mxu0 %vm4377_vm1, %v4376_v8 }
 0x3a0   :  { %v337_v47 = vmul.f32 %v4204_v46, %v4200_v38  ;;  %3862 = vmatprep.subr.mxu0 %v4376_v8 }
 0x3a2   :  { %3850 = vmatmul.mubr.msk.f32.vlgmr.msra.gmra.mrb[6].mxu1 %vm162_vm2, %v337_v47  ;;  %3855 = vmatmul.mubr.msk.f32.vlgmr.msra.gmra.mrb[2].mxu0 %vm162_vm2, %v491_v48 }
 0x3a3   :  { %3858 = vmatpush3.xpose.msk.msra.mxu1 %vm162_vm2, %v571_v41  ;;  %3859 = vmatprep.mubr.msk.f32.mxu1 %vm4377_vm1, %v4376_v8 }
 0x3a4   :  { %3867 = vmatprep.subr.mxu1 %v4376_v8  ;;  %3864 = vmatprep.mubr.msk.f32.mxu0 %vm4377_vm1, %v4376_v8 }
 0x3a6   :  { %3860 = vmatmul.mubr.msk.f32.vlgmr.msra.gmra.mrb[8].mxu1 %vm162_vm2, %v569_v49 }
 0x3a7   :  { %3869 = vmatprep.mubr.msk.f32.mxu1 %vm4377_vm1, %v4376_v8 }
 0x471   :  { %v4560_v50 = vpop.f32.mrb[0].mxu0 }
 0x472   :  { %v3846_v51 = vpop.f32.mrb[1].mxu0 }
 0x475   :  { %v4562_v52 = vpop.f32.mrb[6].mxu1  ;;  %v564_v53 = vpop.f32.mrb[2].mxu0 }
 0x476   :  { %v646_v54 = vmul.f32 0.35355338, %v564_v53  ;;  %v3851_v55 = vpop.f32.mrb[7].mxu1  ;;  %v3856_v56 = vpop.f32.mrb[3].mxu0 }
 0x478   :  { %v648_v57 = vsel %vm162_vm2, %v646_v54, -inf }
 0x479   :  { %v642_v58 = vpop.f32.mrb[8].mxu1  ;;  %649 = vmax.xlane.f32.xlu1 %v648_v57 }
 0x47a   :  { %v647_v59 = vmul.f32 0.35355338, %v642_v58  ;;  %v3861_v60 = vpop.f32.mrb[9].mxu1 }
 0x47c   :  { %v651_v61 = vsel %vm162_vm2, %v647_v59, -inf }
 0x47d   :  { %652 = vmax.xlane.f32.xlu0 %v651_v61 }
 0x48a   :  { %670 = vrot.lane.b32.xlu1 %v4505_v16, %s4382_s26 }
 0x48e   :  { %824 = vrot.lane.b32.xlu1 %v4505_v16, %s4383_s27 }
 0x492   :  { %902 = vrot.lane.b32.xlu1 %v4510_v17, %s4383_s27 }
 0x493   :  { %746 = vrot.lane.b32.xlu0 %v4510_v17, %s4382_s26 }
 0x497   :  { %822 = vrot.lane.b32.xlu0 %v4505_v16, %s4384_s28 }
 0x506   :  { %v650_v62 = vpop.xlane.xlu1 %649 }
 0x507   :  { %v654_v63 = vsub.f32 %v646_v54, %v650_v62 }
 0x509   :  { %v656_v9 = vmul.f32 1.442695, %v654_v63 }
 0x50a   :  { %v671_v11 = vpop.permute.xlu1 %670  ;;  %v653_v14 = vpop.xlane.xlu0 %652 }
 0x50b   :  { %4205 = vpow2.f32 %v656_v9  ;;  %v655_v15 = vsub.f32 %v647_v59, %v653_v14  ;;  %3863 = vmatpush3.msra.mxu0 %v671_v11 }
 0x50c   :  { %3872 = vmatprep.subr.mxu0 %v4376_v8 }
 0x50d   :  { %v658_v18 = vmul.f32 1.442695, %v655_v15 }
 0x50e   :  { %v747_v19 = vpop.permute.xlu0 %746  ;;  %v825_v24 = vpop.permute.xlu1 %824 }
 0x50f   :  { %4207 = vpow2.f32 %v658_v18  ;;  %3868 = vmatpush3.msra.mxu1 %v747_v19 }
 0x510   :  { %3877 = vmatprep.subr.mxu1 %v4376_v8 }
 0x512   :  { %v903_v25 = vpop.permute.xlu1 %902  ;;  %v823_v32 = vpop.permute.xlu0 %822 }
 0x515   :  { %v4206_v20 = vpop.eup %4205 }
 0x516   :  { %v660_v21 = vsel %vm162_vm2, %v4206_v20, 0.0 }
 0x517   :  { %661 = vadd.xlane.f32.xlu1 %v660_v21 }
 0x519   :  { %v4208_v22 = vpop.eup %4207 }
 0x51a   :  { %v663_v23 = vsel %vm162_vm2, %v4208_v22, 0.0 }
 0x51b   :  { %664 = vadd.xlane.f32.xlu1 %v663_v23 }
 0x52c   :  { %900 = vrot.lane.b32.xlu1 %v4510_v17, %s4384_s28 }
 0x5a4   :  { %v662_v26 = vpop.xlane.xlu1 %661 }
 0x5a5   :  { %4209 = vrcp.f32 %v662_v26 }
 0x5a8   :  { %v665_v27 = vpop.xlane.xlu1 %664 }
 0x5a9   :  { %4211 = vrcp.f32 %v665_v27 }
 0x5ac   :  { %v901_v33 = vpop.permute.xlu1 %900 }
 0x5af   :  { %v4210_v28 = vpop.eup %4209 }
 0x5b0   :  { %v668_v29 = vmul.f32 %v4210_v28, %v4206_v20 }
 0x5b2   :  { %3865 = vmatmul.mubr.msk.f32.vlgmr.msra.gmra.mrb[4].mxu0 %vm162_vm2, %v668_v29 }
 0x5b3   :  { %v4212_v30 = vpop.eup %4211  ;;  %3873 = vmatpush3.xpose.msk.msra.mxu0 %vm162_vm2, %v825_v24  ;;  %3874 = vmatprep.mubr.msk.f32.mxu0 %vm4377_vm1, %v4376_v8 }
 0x5b4   :  { %v669_v31 = vmul.f32 %v4212_v30, %v4208_v22  ;;  %3882 = vmatprep.subr.mxu0 %v4376_v8 }
 0x5b6   :  { %3870 = vmatmul.mubr.msk.f32.vlgmr.msra.gmra.mrb[10].mxu1 %vm162_vm2, %v669_v31  ;;  %3875 = vmatmul.mubr.msk.f32.vlgmr.msra.gmra.mrb[6].mxu0 %vm162_vm2, %v823_v32  ;;  %v4187_v32 = vpack.i.bf16 %v4464_v1, %v4462_v0 }
 0x5b7   :  { %3878 = vmatpush3.xpose.msk.msra.mxu1 %vm162_vm2, %v903_v25  ;;  %3879 = vmatprep.mubr.msk.f32.mxu1 %vm4377_vm1, %v4376_v8 }
 0x5b8   :  { %3887 = vmatprep.subr.mxu1 %v4376_v8  ;;  %3884 = vmatprep.mubr.msk.f32.mxu0 %vm4377_vm1, %v4376_v8 }
 0x5ba   :  { %3880 = vmatmul.mubr.msk.f32.vlgmr.msra.gmra.mrb[12].mxu1 %vm162_vm2, %v901_v33  ;;  %v4192_v33 = vpack.i.bf16 %v4472_v4, %v4466_v2 }
 0x5bb   :  { %3889 = vmatprep.mubr.msk.f32.mxu1 %vm4377_vm1, %v4376_v8 }
 0x685   :  { %v4598_v34 = vpop.f32.mrb[4].mxu0 }
 0x686   :  { %v3866_v35 = vpop.f32.mrb[5].mxu0 }
 0x689   :  { %v4600_v36 = vpop.f32.mrb[10].mxu1  ;;  %v896_v37 = vpop.f32.mrb[6].mxu0 }
 0x68a   :  { %v978_v38 = vmul.f32 0.35355338, %v896_v37  ;;  %v3871_v39 = vpop.f32.mrb[11].mxu1  ;;  %v3876_v40 = vpop.f32.mrb[7].mxu0 }
 0x68c   :  { %v980_v41 = vsel %vm162_vm2, %v978_v38, -inf }
 0x68d   :  { %v974_v42 = vpop.f32.mrb[12].mxu1  ;;  %981 = vmax.xlane.f32.xlu0 %v980_v41 }
 0x68e   :  { %v979_v43 = vmul.f32 0.35355338, %v974_v42  ;;  %v3881_v44 = vpop.f32.mrb[13].mxu1 }
 0x690   :  { %v983_v45 = vsel %vm162_vm2, %v979_v43, -inf }
 0x691   :  { %984 = vmax.xlane.f32.xlu1 %v983_v45 }
 0x6a2   :  { %1002 = vrot.lane.b32.xlu1 %v4505_v16, %s4385_s29 }
 0x6a3   :  { %1078 = vrot.lane.b32.xlu0 %v4510_v17, %s4385_s29 }
 0x6a6   :  { %1156 = vrot.lane.b32.xlu1 %v4505_v16, %s4386_s30 }
 0x6aa   :  { %1234 = vrot.lane.b32.xlu1 %v4510_v17, %s4386_s30 }
 0x6ae   :  { %1232 = vrot.lane.b32.xlu1 %v4510_v17, %s4387_s4 }
 0x71a   :  { %v982_v46 = vpop.xlane.xlu0 %981 }
 0x71b   :  { %v986_v47 = vsub.f32 %v978_v38, %v982_v46 }
 0x71d   :  { %v988_v48 = vmul.f32 1.442695, %v986_v47 }
 0x71e   :  { %v985_v49 = vpop.xlane.xlu1 %984  ;;  %v1079_v51 = vpop.permute.xlu0 %1078 }
 0x71f   :  { %4213 = vpow2.f32 %v988_v48  ;;  %v987_v53 = vsub.f32 %v979_v43, %v985_v49  ;;  %3888 = vmatpush3.msra.mxu1 %v1079_v51 }
 0x720   :  { %3897 = vmatprep.subr.mxu1 %v4376_v8 }
 0x721   :  { %v990_v54 = vmul.f32 1.442695, %v987_v53 }
 0x722   :  { %v1003_v55 = vpop.permute.xlu1 %1002 }
 0x723   :  { %4215 = vpow2.f32 %v990_v54  ;;  %3883 = vmatpush3.msra.mxu0 %v1003_v55 }
 0x724   :  { %3892 = vmatprep.subr.mxu0 %v4376_v8 }
 0x726   :  { %v1157_v62 = vpop.permute.xlu1 %1156 }
 0x729   :  { %v4214_v56 = vpop.eup %4213 }
 0x72a   :  { %v992_v57 = vsel %vm162_vm2, %v4214_v56, 0.0  ;;  %v1235_v14 = vpop.permute.xlu1 %1234 }
 0x72b   :  { %993 = vadd.xlane.f32.xlu0 %v992_v57 }
 0x72d   :  { %v4216_v58 = vpop.eup %4215 }
 0x72e   :  { %v995_v59 = vsel %vm162_vm2, %v4216_v58, 0.0  ;;  %v1233_v19 = vpop.permute.xlu1 %1232 }
 0x72f   :  { %996 = vadd.xlane.f32.xlu0 %v995_v59 }
 0x745   :  { %1154 = vrot.lane.b32.xlu0 %v4505_v16, %s4387_s4 }
 0x7b8   :  { %v994_v60 = vpop.xlane.xlu0 %993 }
 0x7b9   :  { %4217 = vrcp.f32 %v994_v60 }
 0x7bc   :  { %v997_v61 = vpop.xlane.xlu0 %996 }
 0x7bd   :  { %4219 = vrcp.f32 %v997_v61 }
 0x7c0   :  { %v1155_v18 = vpop.permute.xlu0 %1154 }
 0x7c3   :  { %v4218_v63 = vpop.eup %4217 }
 0x7c4   :  { %v1000_v9 = vmul.f32 %v4218_v63, %v4214_v56 }
 0x7c6   :  { %3885 = vmatmul.mubr.msk.f32.vlgmr.msra.gmra.mrb[8].mxu0 %vm162_vm2, %v1000_v9 }
 0x7c7   :  { %v4220_v11 = vpop.eup %4219  ;;  %3893 = vmatpush3.xpose.msk.msra.mxu0 %vm162_vm2, %v1157_v62  ;;  %3894 = vmatprep.mubr.msk.f32.mxu0 %vm4377_vm1, %v4376_v8 }
 0x7c8   :  { %v1001_v15 = vmul.f32 %v4220_v11, %v4216_v58  ;;  %3902 = vmatprep.subr.mxu0 %v4376_v8 }
 0x7ca   :  { %3890 = vmatmul.mubr.msk.f32.vlgmr.msra.gmra.mrb[14].mxu1 %vm162_vm2, %v1001_v15  ;;  %3895 = vmatmul.mubr.msk.f32.vlgmr.msra.gmra.mrb[10].mxu0 %vm162_vm2, %v1155_v18 }
 0x7cb   :  { %3898 = vmatpush3.xpose.msk.msra.mxu1 %vm162_vm2, %v1235_v14  ;;  %3899 = vmatprep.mubr.msk.f32.mxu1 %vm4377_vm1, %v4376_v8 }
 0x7cc   :  { %3907 = vmatprep.subr.mxu1 %v4376_v8  ;;  %3904 = vmatprep.mubr.msk.f32.mxu0 %vm4377_vm1, %v4376_v8 }
 0x7ce   :  { %3900 = vmatmul.mubr.msk.f32.vlgmr.msra.gmra.mrb[16].mxu1 %vm162_vm2, %v1233_v19 }
 0x7cf   :  { %3909 = vmatprep.mubr.msk.f32.mxu1 %vm4377_vm1, %v4376_v8 }
 0x899   :  { %v1074_v20 = vpop.f32.mrb[8].mxu0 }
 0x89a   :  { %v3886_v21 = vpop.f32.mrb[9].mxu0 }
 0x89d   :  { %v1150_v22 = vpop.f32.mrb[14].mxu1  ;;  %v1228_v23 = vpop.f32.mrb[10].mxu0 }
 0x89e   :  { %v1310_v24 = vmul.f32 0.35355338, %v1228_v23  ;;  %v3891_v25 = vpop.f32.mrb[15].mxu1  ;;  %v3896_v26 = vpop.f32.mrb[11].mxu0 }
 0x8a0   :  { %v1312_v27 = vsel %vm162_vm2, %v1310_v24, -inf }
 0x8a1   :  { %v1306_v28 = vpop.f32.mrb[16].mxu1  ;;  %1313 = vmax.xlane.f32.xlu0 %v1312_v27 }
 0x8a2   :  { %v1311_v29 = vmul.f32 0.35355338, %v1306_v28  ;;  %v3901_v30 = vpop.f32.mrb[17].mxu1 }
 0x8a4   :  { %v1315_v31 = vsel %vm162_vm2, %v1311_v29, -inf }
 0x8a5   :  { %1316 = vmax.xlane.f32.xlu1 %v1315_v31 }
 0x8b6   :  { %1334 = vrot.lane.b32.xlu1 %v4505_v16, %s4388_s5 }
 0x8ba   :  { %4188 = vrot.lane.b32.xlu1 %v4187_v32, %s4389_s6 }
 0x8be   :  { %4193 = vrot.lane.b32.xlu1 %v4192_v33, %s4389_s6 }
 0x8c2   :  { %1490 = vrot.lane.b32.xlu1 %v4600_v36, %s4374_s25 }
 0x8c6   :  { %1498 = vrot.lane.b32.xlu1 %v1150_v22, %s4390_s7 }
 0x92e   :  { %v1314_v35 = vpop.xlane.xlu0 %1313 }
 0x92f   :  { %v1318_v37 = vsub.f32 %v1310_v24, %v1314_v35 }
 0x931   :  { %v1320_v16 = vmul.f32 1.442695, %v1318_v37 }
 0x932   :  { %v1317_v38 = vpop.xlane.xlu1 %1316 }
 0x933   :  { %4221 = vpow2.f32 %v1320_v16  ;;  %v1319_v0 = vsub.f32 %v1311_v29, %v1317_v38 }
 0x935   :  { %v1322_v1 = vmul.f32 1.442695, %v1319_v0 }
 0x936   :  { %v1335_v39 = vpop.permute.xlu1 %1334 }
 0x937   :  { %4223 = vpow2.f32 %v1322_v1  ;;  %3903 = vmatpush3.msra.mxu0 %v1335_v39  ;;  %v58_v1 = vld [vmem:[#allocation5 + $0x20] sm:$0xff]  ;;  %v59_v39 = vld [vmem:[#allocation5 + $0x28] sm:$0xff] }
 0x93a   :  { %v4189_v40 = vpop.permute.xlu1 %4188 }
 0x93b   :  { %v4191_v2 = vunpack.i.h.bf16 %v4189_v40  ;;  %v4190_v4 = vunpack.i.l.bf16 %v4189_v40  ;;  %v4696_v40 = vpack.c.bf16 %v59_v39, %v58_v1 }
 0x93d   :  { %v4222_v41 = vpop.eup %4221  ;;  %v4649_v42 = vpack.c.bf16 %v4191_v2, %v4190_v4  ;;  %v60_v2 = vld [vmem:[#allocation5 + $0x30] sm:$0xff]  ;;  %v61_v4 = vld [vmem:[#allocation5 + $0x38] sm:$0xff] }
 0x93e   :  { %v1324_v36 = vsel %vm162_vm2, %v4222_v41, 0.0  ;;  %v4194_v47 = vpop.permute.xlu1 %4193 }
 0x93f   :  { %1325 = vadd.xlane.f32.xlu0 %v1324_v36  ;;  %4094 = vmatprep.subr.bf16.mxu0 %v4649_v42  ;;  %v4196_v48 = vunpack.i.h.bf16 %v4194_v47  ;;  %v4195_v49 = vunpack.i.l.bf16 %v4194_v47  ;;  %v62_v36 = vld [vmem:[#allocation5 + $0x40] sm:$0xff] }
 0x941   :  { %v4224_v43 = vpop.eup %4223  ;;  %v4659_v54 = vpack.c.bf16 %v4196_v48, %v4195_v49  ;;  %v66_v48 = vld [vmem:[#allocation5 + $0x60] sm:$0xff]  ;;  %v67_v49 = vld [vmem:[#allocation5 + $0x68] sm:$0xff] }
 0x942   :  { %v1327_v44 = vsel %vm162_vm2, %v4224_v43, 0.0  ;;  %v1491_v61 = vpop.permute.xlu1 %1490 }
 0x943   :  { %1328 = vadd.xlane.f32.xlu0 %v1327_v44  ;;  %v1511_v18 = vsel %vm162_vm2, %v4562_v52, %v1491_v61  ;;  %v64_v44 = vld [vmem:[#allocation5 + $0x50] sm:$0xff] }
 0x946   :  { %v1499_v9 = vpop.permute.xlu1 %1498 }
 0x947   :  { %v1514_v19 = vsel %vm1512_vm4, %v1511_v18, %v1499_v9  ;;  %v68_v18 = vld [vmem:[#allocation5 + $0x70] sm:$0xff] }
 0x959   :  { %1410 = vrot.lane.b32.xlu0 %v4510_v17, %s4388_s5 }
 0x95d   :  { %1488 = vrot.lane.b32.xlu0 %v4598_v34, %s4374_s25 }
 0x961   :  { %1496 = vrot.lane.b32.xlu0 %v1074_v20, %s4390_s7 }
 0x9cc   :  { %v1326_v45 = vpop.xlane.xlu0 %1325 }
 0x9cd   :  { %4225 = vrcp.f32 %v1326_v45 }
 0x9d0   :  { %v1329_v46 = vpop.xlane.xlu0 %1328 }
 0x9d1   :  { %4227 = vrcp.f32 %v1329_v46  ;;  %v65_v46 = vld [vmem:[#allocation5 + $0x58] sm:$0xff] }
 0x9d2   :  { %v4709_v47 = vpack.c.bf16 %v65_v46, %v64_v44 }
 0x9d4   :  { %v1411_v51 = vpop.permute.xlu0 %1410 }
 0x9d5   :  { %3908 = vmatpush3.msra.mxu1 %v1411_v51  ;;  %v4714_v51 = vpack.c.bf16 %v67_v49, %v66_v48 }
 0x9d6   :  { %4102 = vmatprep.subr.bf16.mxu1 %v4696_v40 }
 0x9d7   :  { %v4226_v53 = vpop.eup %4225 }
 0x9d8   :  { %v1332_v55 = vmul.f32 %v4226_v53, %v4222_v41  ;;  %v1489_v60 = vpop.permute.xlu0 %1488  ;;  %v4702_v41 = vpack.c.bf16 %v61_v4, %v60_v2 }
 0x9d9   :  { %v1510_v63 = vsel %vm162_vm2, %v4560_v50, %v1489_v60 }
 0x9da   :  { %3905 = vmatmul.mubr.msk.f32.vlgmr.msra.gmra.mrb[12].mxu0 %vm162_vm2, %v1332_v55 }
 0x9db   :  { %v4228_v17 = vpop.eup %4227  ;;  %4096 = vmatpush3.bf16.msra.mxu0 %v4649_v42 }
 0x9dc   :  { %v1333_v34 = vmul.f32 %v4228_v17, %v4224_v43  ;;  %4098 = vmatprep.subr.bf16.mxu0 %v4659_v54  ;;  %v1497_v62 = vpop.permute.xlu0 %1496  ;;  %v63_v43 = vld [vmem:[#allocation5 + $0x48] sm:$0xff] }
 0x9dd   :  { %v1513_v11 = vsel %vm1512_vm4, %v1510_v63, %v1497_v62  ;;  %v4707_v45 = vpack.c.bf16 %v63_v43, %v62_v36 }
 0x9de   :  { %3910 = vmatmul.mubr.msk.f32.vlgmr.msra.gmra.mrb[18].mxu1 %vm162_vm2, %v1333_v34 }
 0x9df   :  { %4100 = vmatpush3.bf16.msra.mxu0 %v4659_v54  ;;  %4104 = vmatpush3.bf16.msra.mxu1 %v4696_v40 }
 0x9e0   :  { %4106 = vmatprep.subr.bf16.mxu1 %v4702_v41  ;;  %4110 = vmatprep.subr.bf16.mxu0 %v4707_v45 }
 0x9e3   :  { %4108 = vmatpush3.bf16.msra.mxu1 %v4702_v41 }
 0x9e4   :  { %4126 = vmatprep.subr.bf16.mxu1 %v4470_v3 }
 0xaad   :  { %v1406_v56 = vpop.f32.mrb[12].mxu0 }
 0xaae   :  { %1504 = vrot.lane.b32.xlu0 %v1406_v56, %s4391_s8  ;;  %v3906_v57 = vpop.f32.mrb[13].mxu0 }
 0xab1   :  { %v1482_v58 = vpop.f32.mrb[18].mxu1 }
 0xab2   :  { %1506 = vrot.lane.b32.xlu1 %v1482_v58, %s4391_s8  ;;  %v3911_v59 = vpop.f32.mrb[19].mxu1  ;;  %1535 = vrot.lane.b32.xlu0 %v4502_v13, %s4389_s6 }
 0xb20   :  { %v1505_v14 = vpop.permute.xlu0 %1504 }
 0xb21   :  { %v1516_v15 = vsel %vm1515_vm3, %v1513_v11, %v1505_v14 }
 0xb22   :  { %3920 = vmatprep.mubr.msk.f32.mxu0 %vm77_vm0, %v1516_v15 }
 0xb24   :  { %v1507_v20 = vpop.permute.xlu1 %1506  ;;  %v4680_v22 = vpop.permute.xlu0 %1535 }
 0xb25   :  { %v1517_v21 = vsel %vm1515_vm3, %v1514_v19, %v1507_v20  ;;  %v69_v19 = vld [vmem:[#allocation5 + $0x78] sm:$0xff] }
 0xb26   :  { %3921 = vmatmul.mubr.msk.f32.vlgmr.msra.gmra.mrb[14].mxu0 %vm77_vm0, %v1517_v21  ;;  %v4733_v20 = vpack.c.bf16 %v69_v19, %v68_v18  ;;  %v1665_v21 = vsub.s32 1, %v4492_v10 }
 0xb27   :  { %4112 = vmatpush3.bf16.msra.mxu0 %v4707_v45 }
 0xb28   :  { %4114 = vmatprep.subr.bf16.mxu0 %v4709_v47 }
 0xb2b   :  { %4116 = vmatpush3.bf16.msra.mxu0 %v4709_v47 }
 0xb2c   :  { %4118 = vmatprep.subr.bf16.mxu0 %v4714_v51 }
 0xb2f   :  { %4120 = vmatpush3.bf16.msra.mxu0 %v4714_v51 }
 0xb30   :  { %4122 = vmatprep.subr.bf16.mxu0 %v4733_v20 }
 0xb33   :  { %4124 = vmatpush3.bf16.msra.mxu0 %v4733_v20 }
 0xb34   :  { %3974 = vmatprep.subr.mxu0 %v4376_v8 }
 0xbf9   :  { %v3922_v50 = vpop.f32.mrb[14].mxu0 }
 0xbfa   :  { %v1616_v23 = vadd.f32 %v3922_v50, %v4680_v22  ;;  %v1610_v24 = vpop.f32.mrb[15].mxu0 }
 0xbfb   :  { %v1611_v25 = vadd.f32 %v1610_v24, %v4680_v22 }
 0xbfc   :  { %v1620_v26 = vadd.f32 %v1616_v23, %v4486_v7 }
 0xbfd   :  { %v1619_v27 = vadd.f32 %v1611_v25, %v4474_v5  ;;  %v1650_v5 = vsub.s32 2, %v4492_v10 }
 0xbfe   :  { %v1624_v52 = vsel %vm77_vm0, %v1620_v26, 0.0 }
 0xbff   :  { %1625 = vadd.xlane.f32.xlu0 %v1624_v52  ;;  %v1621_v28 = vsel %vm77_vm0, %v1619_v27, 0.0  ;;  %v4692_v0 = vrot.slane %v4499_v12, %v1650_v5 }
 0xc00   :  { %1622 = vadd.xlane.f32.xlu1 %v1621_v28 }
 0xc8c   :  { %v1626_v29 = vpop.xlane.xlu0 %1625 }
 0xc8d   :  { %v1629_v30 = vmul.f32 0.03125, %v1626_v29  ;;  %v1623_v31 = vpop.xlane.xlu1 %1622 }
 0xc8e   :  { %v1628_v32 = vmul.f32 0.03125, %v1623_v31 }
 0xc8f   :  { %v1631_v33 = vsub.f32 %v1620_v26, %v1629_v30 }
 0xc90   :  { %v1630_v35 = vsub.f32 %v1619_v27, %v1628_v32 }
 0xc91   :  { %v1633_v37 = vmul.f32 %v1631_v33, %v1631_v33 }
 0xc92   :  { %v1632_v16 = vmul.f32 %v1630_v35, %v1630_v35 }
 0xc93   :  { %v1637_v38 = vsel %vm77_vm0, %v1633_v37, 0.0 }
 0xc94   :  { %1638 = vadd.xlane.f32.xlu1 %v1637_v38  ;;  %v1634_v7 = vsel %vm77_vm0, %v1632_v16, 0.0 }
 0xc95   :  { %1635 = vadd.xlane.f32.xlu0 %v1634_v7 }
 0xca5   :  { %1658 = vrot.lane.b32.xlu1 %v4692_v0, %s4379_s21 }
 0xcab   :  { %1653 = vrot.lane.b32.xlu0 %v4692_v0, %s4378_s2 }
 0xd21   :  { %v1639_v53 = vpop.xlane.xlu1 %1638 }
 0xd22   :  { %v1641_v55 = vmul.f32 0.03125, %v1639_v53  ;;  %v1636_v17 = vpop.xlane.xlu0 %1635  ;;  %v1867_v53 = vsub.s32 3, %v4492_v10 }
 0xd23   :  { %v1640_v34 = vmul.f32 0.03125, %v1636_v17 }
 0xd24   :  { %v1643_v56 = vadd.f32 1e-05, %v1641_v55 }
 0xd25   :  { %v1642_v57 = vadd.f32 1e-05, %v1640_v34  ;;  %v4722_v9 = vpop.permute.xlu1 %1658 }
 0xd26   :  { %4229 = vrsqrt.f32 %v1643_v56  ;;  %v4719_v59 = vpop.permute.xlu0 %1653 }
 0xd27   :  { %4231 = vrsqrt.f32 %v1642_v57 }
 0xd30   :  { %v4230_v58 = vpop.eup %4229 }
 0xd31   :  { %v4232_v60 = vpop.eup %4231  ;;  %v1647_v61 = vmul.f32 %v4230_v58, %v1631_v33  ;;  %v4760_v58 = vrot.slane %v4499_v12, %v1867_v53 }
 0xd32   :  { %v1646_v62 = vmul.f32 %v4232_v60, %v1630_v35 }
 0xd33   :  { %v1657_v63 = vmul.f32 %v4719_v59, %v1647_v61 }
 0xd34   :  { %v1656_v11 = vmul.f32 %v4719_v59, %v1646_v62 }
 0xd35   :  { %v1662_v15 = vadd.f32 %v4722_v9, %v1657_v63 }
 0xd36   :  { %v1661_v14 = vadd.f32 %v4722_v9, %v1656_v11 }
 0xd38   :  { %3931 = vmatprep.mubr.msk.f32.mxu1 %vm77_vm0, %v1661_v14 }
 0xd39   :  { %3932 = vmatmul.mubr.msk.f32.vlgmr.msra.gmra.mrb[20].mxu1 %vm77_vm0, %v1662_v15 }
 0xd3a   :  { %4128 = vmatpush3.bf16.msra.mxu1 %v4470_v3  ;;  %v4740_v3 = vrot.slane %v4499_v12, %v1665_v21 }
 0xd3b   :  { %4130 = vmatprep.subr.bf16.mxu1 %v4478_v6 }
 0xd3e   :  { %4132 = vmatpush3.bf16.msra.mxu1 %v4478_v6 }
 0xd3f   :  { %3964 = vmatprep.subr.mxu1 %v4376_v8 }
 0xe0c   :  { %v3933_v50 = vpop.f32.mrb[20].mxu1 }
 0xe0d   :  { %v1745_v6 = vadd.f32 %v3933_v50, %v4740_v3  ;;  %v1739_v23 = vpop.f32.mrb[21].mxu1 }
 0xe0e   :  { %v1740_v24 = vadd.f32 %v1739_v23, %v4740_v3 }
 0xe0f   :  { %v1749_v26 = vmax.f32 %v1745_v6, 0.0 }
 0xe10   :  { %v1748_v25 = vmax.f32 %v1740_v24, 0.0 }
 0xe12   :  { %3950 = vmatprep.mubr.msk.f32.mxu0 %vm1750_vm5, %v1748_v25 }
 0xe13   :  { %3951 = vmatmul.mubr.msk.f32.vlgmr.msra.gmra.mrb[16].mxu0 %vm1750_vm5, %v1749_v26 }
 0xe14   :  { %3976 = vmatprep.mubr.msk.f32.mxu0 %vm4377_vm1, %v4376_v8 }
 0xee6   :  { %v3952_v27 = vpop.f32.mrb[16].mxu0 }
 0xee7   :  { %v1829_v52 = vadd.f32 %v3952_v27, %v4692_v0  ;;  %v1823_v28 = vpop.f32.mrb[17].mxu0 }
 0xee8   :  { %v1824_v29 = vadd.f32 %v1823_v28, %v4692_v0 }
 0xee9   :  { %v1833_v30 = vadd.f32 %v1829_v52, %v1662_v15 }
 0xeea   :  { %v1832_v31 = vadd.f32 %v1824_v29, %v1661_v14 }
 0xeeb   :  { %v1837_v32 = vsel %vm77_vm0, %v1833_v30, 0.0 }
 0xeec   :  { %1838 = vadd.xlane.f32.xlu0 %v1837_v32  ;;  %v1834_v33 = vsel %vm77_vm0, %v1832_v31, 0.0 }
 0xeed   :  { %1835 = vadd.xlane.f32.xlu1 %v1834_v33 }
 0xf79   :  { %v1839_v35 = vpop.xlane.xlu0 %1838 }
 0xf7a   :  { %v1841_v37 = vmul.f32 0.03125, %v1839_v35  ;;  %v1836_v16 = vpop.xlane.xlu1 %1835 }
 0xf7b   :  { %v1840_v38 = vmul.f32 0.03125, %v1836_v16 }
 0xf7c   :  { %v1843_v7 = vsub.f32 %v1833_v30, %v1841_v37 }
 0xf7d   :  { %v1842_v5 = vsub.f32 %v1832_v31, %v1840_v38 }
 0xf7e   :  { %v1845_v1 = vmul.f32 %v1843_v7, %v1843_v7 }
 0xf7f   :  { %v1844_v39 = vmul.f32 %v1842_v5, %v1842_v5 }
 0xf80   :  { %v1849_v2 = vsel %vm77_vm0, %v1845_v1, 0.0 }
 0xf81   :  { %1850 = vadd.xlane.f32.xlu1 %v1849_v2  ;;  %v1846_v4 = vsel %vm77_vm0, %v1844_v39, 0.0 }
 0xf82   :  { %1847 = vadd.xlane.f32.xlu0 %v1846_v4 }
 0xf98   :  { %1860 = vrot.lane.b32.xlu0 %v4692_v0, %s4389_s6 }
0x100e   :  { %v1851_v36 = vpop.xlane.xlu1 %1850 }
0x100f   :  { %v1853_v43 = vmul.f32 0.03125, %v1851_v36  ;;  %v1848_v44 = vpop.xlane.xlu0 %1847 }
0x1010   :  { %v1852_v46 = vmul.f32 0.03125, %v1848_v44 }
0x1011   :  { %v1855_v48 = vadd.f32 1e-05, %v1853_v43 }
0x1012   :  { %v1854_v49 = vadd.f32 1e-05, %v1852_v46 }
0x1013   :  { %4233 = vrsqrt.f32 %v1855_v48  ;;  %v4757_v17 = vpop.permute.xlu0 %1860 }
0x1014   :  { %4235 = vrsqrt.f32 %v1854_v49 }
0x101d   :  { %v4234_v55 = vpop.eup %4233 }
0x101e   :  { %v4236_v34 = vpop.eup %4235  ;;  %v1859_v56 = vmul.f32 %v4234_v55, %v1843_v7 }
0x101f   :  { %v1858_v57 = vmul.f32 %v4236_v34, %v1842_v5 }
0x1020   :  { %v1864_v60 = vmul.f32 %v4757_v17, %v1859_v56 }
0x1021   :  { %v1863_v61 = vmul.f32 %v4757_v17, %v1858_v57 }
0x1022   :  { %v4768_v63 = vadd.f32 %v4760_v58, %v1864_v60 }
0x1023   :  { %v4765_v62 = vadd.f32 %v4760_v58, %v1863_v61 }
0x1025   :  { %3961 = vmatprep.mubr.msk.f32.mxu1 %vm77_vm0, %v4765_v62 }
0x1026   :  { %3962 = vmatmul.mubr.msk.f32.vlgmr.msra.gmra.mrb[22].mxu1 %vm77_vm0, %v4768_v63 }
0x1027   :  { %3966 = vmatprep.mubr.msk.f32.mxu1 %vm4377_vm1, %v4376_v8 }
0x10f9   :  { %v3963_v10 = vpop.f32.mrb[22].mxu1 }
0x10fa   :  { %v1943_v12 = vpop.f32.mrb[23].mxu1  ;;  %v4782_v14 = vadd.f32 %v3963_v10, %v4502_v13 }
0x10fb   :  { %v4777_v11 = vadd.f32 %v1943_v12, %v4502_v13 }
0x10fd   :  { %1953 = vrot.lane.b32.xlu1 %v4777_v11, %s4378_s2 }
0x1101   :  { %2030 = vrot.lane.b32.xlu1 %v4782_v14, %s4378_s2 }
0x116f   :  { %v1954_v15 = vpop.permute.xlu1 %1953 }
0x1170   :  { %3965 = vmatpush3.xpose.msk.msra.mxu1 %vm162_vm2, %v1954_v15 }
0x1171   :  { %3969 = vmatprep.subr.mxu1 %v4376_v8 }
0x1173   :  { %3967 = vmatmul.mubr.msk.f32.vlgmr.msra.gmra.mrb[24].mxu1 %vm162_vm2, %v4777_v11  ;;  %v2031_v18 = vpop.permute.xlu1 %2030 }
0x1174   :  { %3970 = vmatpush3.xpose.msk.msra.mxu1 %vm162_vm2, %v2031_v18  ;;  %3971 = vmatprep.mubr.msk.f32.mxu1 %vm4377_vm1, %v4376_v8 }
0x1175   :  { %3979 = vmatprep.subr.mxu1 %v4376_v8 }
0x1177   :  { %3972 = vmatmul.mubr.msk.f32.vlgmr.msra.gmra.mrb[26].mxu1 %vm162_vm2, %v4782_v14 }
0x1178   :  { %3981 = vmatprep.mubr.msk.f32.mxu1 %vm4377_vm1, %v4376_v8 }
0x1246   :  { %v2025_v13 = vpop.f32.mrb[24].mxu1 }
0x1247   :  { %v2106_v19 = vmul.f32 0.35355338, %v2025_v13  ;;  %v3968_v21 = vpop.f32.mrb[25].mxu1 }
0x1249   :  { %v2108_v50 = vsel %vm162_vm2, %v2106_v19, -inf }
0x124a   :  { %2109 = vmax.xlane.f32.xlu0 %v2108_v50  ;;  %v2102_v6 = vpop.f32.mrb[26].mxu1 }
0x124b   :  { %v2107_v23 = vmul.f32 0.35355338, %v2102_v6  ;;  %v3973_v24 = vpop.f32.mrb[27].mxu1 }
0x124d   :  { %v2111_v25 = vsel %vm162_vm2, %v2107_v23, -inf }
0x124e   :  { %2112 = vmax.xlane.f32.xlu1 %v2111_v25 }
0x125f   :  { %2130 = vrot.lane.b32.xlu1 %v4777_v11, %s4379_s21 }
0x1260   :  { %2206 = vrot.lane.b32.xlu0 %v4782_v14, %s4379_s21 }
0x1263   :  { %2284 = vrot.lane.b32.xlu1 %v4777_v11, %s4380_s22 }
0x1267   :  { %2362 = vrot.lane.b32.xlu1 %v4782_v14, %s4380_s22 }
0x126b   :  { %2360 = vrot.lane.b32.xlu1 %v4782_v14, %s4381_s23 }
0x12d7   :  { %v2110_v26 = vpop.xlane.xlu0 %2109 }
0x12d8   :  { %v2114_v27 = vsub.f32 %v2106_v19, %v2110_v26 }
0x12da   :  { %v2116_v52 = vmul.f32 1.442695, %v2114_v27 }
0x12db   :  { %v2207_v28 = vpop.permute.xlu0 %2206  ;;  %v2113_v29 = vpop.xlane.xlu1 %2112 }
0x12dc   :  { %4237 = vpow2.f32 %v2116_v52  ;;  %v2115_v30 = vsub.f32 %v2107_v23, %v2113_v29  ;;  %3980 = vmatpush3.msra.mxu1 %v2207_v28 }
0x12dd   :  { %3989 = vmatprep.subr.mxu1 %v4376_v8 }
0x12de   :  { %v2118_v31 = vmul.f32 1.442695, %v2115_v30 }
0x12df   :  { %v2131_v32 = vpop.permute.xlu1 %2130 }
0x12e0   :  { %4239 = vpow2.f32 %v2118_v31  ;;  %3975 = vmatpush3.msra.mxu0 %v2131_v32 }
0x12e1   :  { %3984 = vmatprep.subr.mxu0 %v4376_v8 }
0x12e3   :  { %v2285_v5 = vpop.permute.xlu1 %2284 }
0x12e6   :  { %v4238_v33 = vpop.eup %4237 }
0x12e7   :  { %v2120_v35 = vsel %vm162_vm2, %v4238_v33, 0.0  ;;  %v2363_v4 = vpop.permute.xlu1 %2362 }
0x12e8   :  { %2121 = vadd.xlane.f32.xlu0 %v2120_v35 }
0x12ea   :  { %v4240_v37 = vpop.eup %4239 }
0x12eb   :  { %v2123_v16 = vsel %vm162_vm2, %v4240_v37, 0.0  ;;  %v2361_v44 = vpop.permute.xlu1 %2360 }
0x12ec   :  { %2124 = vadd.xlane.f32.xlu0 %v2123_v16 }
0x1302   :  { %2282 = vrot.lane.b32.xlu0 %v4777_v11, %s4381_s23 }
0x1375   :  { %v2122_v38 = vpop.xlane.xlu0 %2121 }
0x1376   :  { %4241 = vrcp.f32 %v2122_v38 }
0x1379   :  { %v2125_v7 = vpop.xlane.xlu0 %2124 }
0x137a   :  { %4243 = vrcp.f32 %v2125_v7 }
0x137d   :  { %v2283_v43 = vpop.permute.xlu0 %2282 }
0x1380   :  { %v4242_v1 = vpop.eup %4241 }
0x1381   :  { %v2128_v39 = vmul.f32 %v4242_v1, %v4238_v33 }
0x1383   :  { %3977 = vmatmul.mubr.msk.f32.vlgmr.msra.gmra.mrb[18].mxu0 %vm162_vm2, %v2128_v39 }
0x1384   :  { %v4244_v2 = vpop.eup %4243  ;;  %3985 = vmatpush3.xpose.msk.msra.mxu0 %vm162_vm2, %v2285_v5  ;;  %3986 = vmatprep.mubr.msk.f32.mxu0 %vm4377_vm1, %v4376_v8 }
0x1385   :  { %v2129_v36 = vmul.f32 %v4244_v2, %v4240_v37  ;;  %3994 = vmatprep.subr.mxu0 %v4376_v8 }
0x1387   :  { %3982 = vmatmul.mubr.msk.f32.vlgmr.msra.gmra.mrb[28].mxu1 %vm162_vm2, %v2129_v36  ;;  %3987 = vmatmul.mubr.msk.f32.vlgmr.msra.gmra.mrb[20].mxu0 %vm162_vm2, %v2283_v43 }
0x1388   :  { %3990 = vmatpush3.xpose.msk.msra.mxu1 %vm162_vm2, %v2363_v4  ;;  %3991 = vmatprep.mubr.msk.f32.mxu1 %vm4377_vm1, %v4376_v8 }
0x1389   :  { %3999 = vmatprep.subr.mxu1 %v4376_v8  ;;  %3996 = vmatprep.mubr.msk.f32.mxu0 %vm4377_vm1, %v4376_v8 }
0x138b   :  { %3992 = vmatmul.mubr.msk.f32.vlgmr.msra.gmra.mrb[30].mxu1 %vm162_vm2, %v2361_v44 }
0x138c   :  { %4001 = vmatprep.mubr.msk.f32.mxu1 %vm4377_vm1, %v4376_v8 }
0x1456   :  { %v4832_v46 = vpop.f32.mrb[18].mxu0 }
0x1457   :  { %v3978_v48 = vpop.f32.mrb[19].mxu0 }
0x145a   :  { %v4834_v49 = vpop.f32.mrb[28].mxu1  ;;  %v2356_v53 = vpop.f32.mrb[20].mxu0 }
0x145b   :  { %v2438_v55 = vmul.f32 0.35355338, %v2356_v53  ;;  %v3983_v34 = vpop.f32.mrb[29].mxu1  ;;  %v3988_v56 = vpop.f32.mrb[21].mxu0 }
0x145d   :  { %v2440_v57 = vsel %vm162_vm2, %v2438_v55, -inf }
0x145e   :  { %2441 = vmax.xlane.f32.xlu0 %v2440_v57  ;;  %v2434_v60 = vpop.f32.mrb[30].mxu1 }
0x145f   :  { %v2439_v61 = vmul.f32 0.35355338, %v2434_v60  ;;  %v3993_v10 = vpop.f32.mrb[31].mxu1 }
0x1461   :  { %v2443_v12 = vsel %vm162_vm2, %v2439_v61, -inf }
0x1462   :  { %2444 = vmax.xlane.f32.xlu1 %v2443_v12 }
0x1473   :  { %2462 = vrot.lane.b32.xlu1 %v4777_v11, %s4382_s26 }
0x1474   :  { %2538 = vrot.lane.b32.xlu0 %v4782_v14, %s4382_s26 }
0x1477   :  { %2616 = vrot.lane.b32.xlu1 %v4777_v11, %s4383_s27 }
0x147b   :  { %2694 = vrot.lane.b32.xlu1 %v4782_v14, %s4383_s27 }
0x147f   :  { %2692 = vrot.lane.b32.xlu1 %v4782_v14, %s4384_s28 }
0x14eb   :  { %v2442_v15 = vpop.xlane.xlu0 %2441 }
0x14ec   :  { %v2446_v18 = vsub.f32 %v2438_v55, %v2442_v15 }
0x14ee   :  { %v2448_v13 = vmul.f32 1.442695, %v2446_v18 }
0x14ef   :  { %v2539_v19 = vpop.permute.xlu0 %2538  ;;  %v2445_v21 = vpop.xlane.xlu1 %2444 }
0x14f0   :  { %4245 = vpow2.f32 %v2448_v13  ;;  %v2447_v50 = vsub.f32 %v2439_v61, %v2445_v21  ;;  %4000 = vmatpush3.msra.mxu1 %v2539_v19 }
0x14f1   :  { %4009 = vmatprep.subr.mxu1 %v4376_v8 }
0x14f2   :  { %v2450_v6 = vmul.f32 1.442695, %v2447_v50 }
0x14f3   :  { %v2463_v23 = vpop.permute.xlu1 %2462 }
0x14f4   :  { %4247 = vpow2.f32 %v2450_v6  ;;  %3995 = vmatpush3.msra.mxu0 %v2463_v23 }
0x14f5   :  { %4004 = vmatprep.subr.mxu0 %v4376_v8 }
0x14f7   :  { %v2617_v29 = vpop.permute.xlu1 %2616 }
0x14fa   :  { %v4246_v24 = vpop.eup %4245 }
0x14fb   :  { %v2452_v25 = vsel %vm162_vm2, %v4246_v24, 0.0  ;;  %v2695_v33 = vpop.permute.xlu1 %2694 }
0x14fc   :  { %2453 = vadd.xlane.f32.xlu0 %v2452_v25 }
0x14fe   :  { %v4248_v26 = vpop.eup %4247 }
0x14ff   :  { %v2455_v27 = vsel %vm162_vm2, %v4248_v26, 0.0  ;;  %v2693_v16 = vpop.permute.xlu1 %2692 }
0x1500   :  { %2456 = vadd.xlane.f32.xlu0 %v2455_v27 }
0x1516   :  { %2614 = vrot.lane.b32.xlu0 %v4777_v11, %s4384_s28 }
0x1589   :  { %v2454_v52 = vpop.xlane.xlu0 %2453 }
0x158a   :  { %4249 = vrcp.f32 %v2454_v52 }
0x158d   :  { %v2457_v28 = vpop.xlane.xlu0 %2456 }
0x158e   :  { %4251 = vrcp.f32 %v2457_v28 }
0x1591   :  { %v2615_v37 = vpop.permute.xlu0 %2614 }
0x1594   :  { %v4250_v30 = vpop.eup %4249 }
0x1595   :  { %v2460_v31 = vmul.f32 %v4250_v30, %v4246_v24 }
0x1597   :  { %3997 = vmatmul.mubr.msk.f32.vlgmr.msra.gmra.mrb[22].mxu0 %vm162_vm2, %v2460_v31 }
0x1598   :  { %v4252_v32 = vpop.eup %4251  ;;  %4005 = vmatpush3.xpose.msk.msra.mxu0 %vm162_vm2, %v2617_v29  ;;  %4006 = vmatprep.mubr.msk.f32.mxu0 %vm4377_vm1, %v4376_v8 }
0x1599   :  { %v2461_v35 = vmul.f32 %v4252_v32, %v4248_v26  ;;  %4014 = vmatprep.subr.mxu0 %v4376_v8 }
0x159b   :  { %4002 = vmatmul.mubr.msk.f32.vlgmr.msra.gmra.mrb[32].mxu1 %vm162_vm2, %v2461_v35  ;;  %4007 = vmatmul.mubr.msk.f32.vlgmr.msra.gmra.mrb[24].mxu0 %vm162_vm2, %v2615_v37 }
0x159c   :  { %4010 = vmatpush3.xpose.msk.msra.mxu1 %vm162_vm2, %v2695_v33  ;;  %4011 = vmatprep.mubr.msk.f32.mxu1 %vm4377_vm1, %v4376_v8 }
0x159d   :  { %4019 = vmatprep.subr.mxu1 %v4376_v8  ;;  %4016 = vmatprep.mubr.msk.f32.mxu0 %vm4377_vm1, %v4376_v8 }
0x159f   :  { %4012 = vmatmul.mubr.msk.f32.vlgmr.msra.gmra.mrb[34].mxu1 %vm162_vm2, %v2693_v16 }
0x15a0   :  { %4021 = vmatprep.mubr.msk.f32.mxu1 %vm4377_vm1, %v4376_v8 }
0x166a   :  { %v4870_v38 = vpop.f32.mrb[22].mxu0 }
0x166b   :  { %v3998_v7 = vpop.f32.mrb[23].mxu0 }
0x166e   :  { %v4872_v5 = vpop.f32.mrb[32].mxu1  ;;  %v2688_v1 = vpop.f32.mrb[24].mxu0 }
0x166f   :  { %v2770_v39 = vmul.f32 0.35355338, %v2688_v1  ;;  %v4003_v2 = vpop.f32.mrb[33].mxu1  ;;  %v4008_v4 = vpop.f32.mrb[25].mxu0 }
0x1671   :  { %v2772_v36 = vsel %vm162_vm2, %v2770_v39, -inf }
0x1672   :  { %2773 = vmax.xlane.f32.xlu0 %v2772_v36  ;;  %v2766_v43 = vpop.f32.mrb[34].mxu1 }
0x1673   :  { %v2771_v44 = vmul.f32 0.35355338, %v2766_v43  ;;  %v4013_v48 = vpop.f32.mrb[35].mxu1 }
0x1675   :  { %v2775_v53 = vsel %vm162_vm2, %v2771_v44, -inf }
0x1676   :  { %2776 = vmax.xlane.f32.xlu1 %v2775_v53 }
0x1687   :  { %2794 = vrot.lane.b32.xlu1 %v4777_v11, %s4385_s29 }
0x1688   :  { %2870 = vrot.lane.b32.xlu0 %v4782_v14, %s4385_s29 }
0x168b   :  { %2948 = vrot.lane.b32.xlu1 %v4777_v11, %s4386_s30 }
0x168f   :  { %3026 = vrot.lane.b32.xlu1 %v4782_v14, %s4386_s30 }
0x1693   :  { %3024 = vrot.lane.b32.xlu1 %v4782_v14, %s4387_s4 }
0x16ff   :  { %v2774_v55 = vpop.xlane.xlu0 %2773 }
0x1700   :  { %v2778_v34 = vsub.f32 %v2770_v39, %v2774_v55 }
0x1702   :  { %v2780_v56 = vmul.f32 1.442695, %v2778_v34 }
0x1703   :  { %v2871_v57 = vpop.permute.xlu0 %2870  ;;  %v2777_v60 = vpop.xlane.xlu1 %2776 }
0x1704   :  { %4253 = vpow2.f32 %v2780_v56  ;;  %v2779_v61 = vsub.f32 %v2771_v44, %v2777_v60  ;;  %4020 = vmatpush3.msra.mxu1 %v2871_v57 }
0x1705   :  { %4029 = vmatprep.subr.mxu1 %v4376_v8 }
0x1706   :  { %v2782_v10 = vmul.f32 1.442695, %v2779_v61 }
0x1707   :  { %v2795_v12 = vpop.permute.xlu1 %2794 }
0x1708   :  { %4255 = vpow2.f32 %v2782_v10  ;;  %4015 = vmatpush3.msra.mxu0 %v2795_v12 }
0x1709   :  { %4024 = vmatprep.subr.mxu0 %v4376_v8 }
0x170b   :  { %v2949_v6 = vpop.permute.xlu1 %2948 }
0x170e   :  { %v4254_v15 = vpop.eup %4253 }
0x170f   :  { %v2784_v18 = vsel %vm162_vm2, %v4254_v15, 0.0  ;;  %v3027_v26 = vpop.permute.xlu1 %3026 }
0x1710   :  { %2785 = vadd.xlane.f32.xlu0 %v2784_v18 }
0x1712   :  { %v4256_v13 = vpop.eup %4255 }
0x1713   :  { %v2787_v19 = vsel %vm162_vm2, %v4256_v13, 0.0  ;;  %v3025_v28 = vpop.permute.xlu1 %3024 }
0x1714   :  { %2788 = vadd.xlane.f32.xlu0 %v2787_v19 }
0x172a   :  { %2946 = vrot.lane.b32.xlu0 %v4777_v11, %s4387_s4 }
0x179d   :  { %v2786_v21 = vpop.xlane.xlu0 %2785 }
0x179e   :  { %4257 = vrcp.f32 %v2786_v21 }
0x17a1   :  { %v2789_v50 = vpop.xlane.xlu0 %2788 }
0x17a2   :  { %4259 = vrcp.f32 %v2789_v50 }
0x17a5   :  { %v2947_v52 = vpop.permute.xlu0 %2946 }
0x17a8   :  { %v4258_v23 = vpop.eup %4257 }
0x17a9   :  { %v2792_v24 = vmul.f32 %v4258_v23, %v4254_v15 }
0x17ab   :  { %4017 = vmatmul.mubr.msk.f32.vlgmr.msra.gmra.mrb[26].mxu0 %vm162_vm2, %v2792_v24 }
0x17ac   :  { %v4260_v25 = vpop.eup %4259  ;;  %4025 = vmatpush3.xpose.msk.msra.mxu0 %vm162_vm2, %v2949_v6  ;;  %4026 = vmatprep.mubr.msk.f32.mxu0 %vm4377_vm1, %v4376_v8 }
0x17ad   :  { %v2793_v27 = vmul.f32 %v4260_v25, %v4256_v13  ;;  %4034 = vmatprep.subr.mxu0 %v4376_v8 }
0x17af   :  { %4022 = vmatmul.mubr.msk.f32.vlgmr.msra.gmra.mrb[36].mxu1 %vm162_vm2, %v2793_v27  ;;  %4027 = vmatmul.mubr.msk.f32.vlgmr.msra.gmra.mrb[28].mxu0 %vm162_vm2, %v2947_v52 }
0x17b0   :  { %4030 = vmatpush3.xpose.msk.msra.mxu1 %vm162_vm2, %v3027_v26  ;;  %4031 = vmatprep.mubr.msk.f32.mxu1 %vm4377_vm1, %v4376_v8 }
0x17b1   :  { %4039 = vmatprep.subr.mxu1 %v4376_v8  ;;  %4036 = vmatprep.mubr.msk.f32.mxu0 %vm4377_vm1, %v4376_v8 }
0x17b3   :  { %4032 = vmatmul.mubr.msk.f32.vlgmr.msra.gmra.mrb[38].mxu1 %vm162_vm2, %v3025_v28 }
0x17b4   :  { %4041 = vmatprep.mubr.msk.f32.mxu1 %vm4377_vm1, %v4376_v8 }
0x187e   :  { %v2866_v29 = vpop.f32.mrb[26].mxu0 }
0x187f   :  { %v4018_v30 = vpop.f32.mrb[27].mxu0 }
0x1882   :  { %v2942_v31 = vpop.f32.mrb[36].mxu1  ;;  %v3020_v32 = vpop.f32.mrb[28].mxu0 }
0x1883   :  { %v3102_v33 = vmul.f32 0.35355338, %v3020_v32  ;;  %v4023_v35 = vpop.f32.mrb[37].mxu1  ;;  %v4028_v37 = vpop.f32.mrb[29].mxu0 }
0x1885   :  { %v3104_v16 = vsel %vm162_vm2, %v3102_v33, -inf }
0x1886   :  { %3105 = vmax.xlane.f32.xlu0 %v3104_v16  ;;  %v3098_v7 = vpop.f32.mrb[38].mxu1 }
0x1887   :  { %v3103_v1 = vmul.f32 0.35355338, %v3098_v7  ;;  %v4033_v39 = vpop.f32.mrb[39].mxu1 }
0x1889   :  { %v3107_v2 = vsel %vm162_vm2, %v3103_v1, -inf }
0x188a   :  { %3108 = vmax.xlane.f32.xlu1 %v3107_v2 }
0x189b   :  { %3126 = vrot.lane.b32.xlu1 %v4777_v11, %s4388_s5 }
0x189f   :  { %3280 = vrot.lane.b32.xlu1 %v4870_v38, %s4374_s25 }
0x18a3   :  { %3282 = vrot.lane.b32.xlu1 %v4872_v5, %s4374_s25 }
0x18a7   :  { %3290 = vrot.lane.b32.xlu1 %v2942_v31, %s4390_s7 }
0x1913   :  { %v3106_v8 = vpop.xlane.xlu0 %3105 }
0x1914   :  { %v3110_v4 = vsub.f32 %v3102_v33, %v3106_v8 }
0x1916   :  { %v3112_v36 = vmul.f32 1.442695, %v3110_v4 }
0x1917   :  { %v3109_v43 = vpop.xlane.xlu1 %3108 }
0x1918   :  { %4261 = vpow2.f32 %v3112_v36  ;;  %v3111_v44 = vsub.f32 %v3103_v1, %v3109_v43 }
0x191a   :  { %v3114_v48 = vmul.f32 1.442695, %v3111_v44 }
0x191b   :  { %v3127_v53 = vpop.permute.xlu1 %3126 }
0x191c   :  { %4263 = vpow2.f32 %v3114_v48  ;;  %4035 = vmatpush3.msra.mxu0 %v3127_v53 }
0x191d   :  { %4134 = vmatprep.subr.bf16.mxu0 %v4649_v42 }
0x191f   :  { %v3281_v13 = vpop.permute.xlu1 %3280 }
0x1922   :  { %v4262_v11 = vpop.eup %4261 }
0x1923   :  { %v3116_v38 = vsel %vm162_vm2, %v4262_v11, 0.0  ;;  %v3283_v19 = vpop.permute.xlu1 %3282 }
0x1924   :  { %3117 = vadd.xlane.f32.xlu0 %v3116_v38  ;;  %v3303_v23 = vsel %vm162_vm2, %v4834_v49, %v3283_v19 }
0x1926   :  { %v4264_v55 = vpop.eup %4263 }
0x1927   :  { %v3119_v5 = vsel %vm162_vm2, %v4264_v55, 0.0 }
0x1928   :  { %3120 = vadd.xlane.f32.xlu0 %v3119_v5 }
0x193e   :  { %3202 = vrot.lane.b32.xlu0 %v4782_v14, %s4388_s5 }
0x1942   :  { %3288 = vrot.lane.b32.xlu0 %v2866_v29, %s4390_s7 }
0x19b1   :  { %v3118_v34 = vpop.xlane.xlu0 %3117 }
0x19b2   :  { %4265 = vrcp.f32 %v3118_v34 }
0x19b5   :  { %v3121_v56 = vpop.xlane.xlu0 %3120 }
0x19b6   :  { %4267 = vrcp.f32 %v3121_v56 }
0x19b9   :  { %v3203_v57 = vpop.permute.xlu0 %3202 }
0x19ba   :  { %4040 = vmatpush3.msra.mxu1 %v3203_v57 }
0x19bb   :  { %4142 = vmatprep.subr.bf16.mxu1 %v4696_v40 }
0x19bc   :  { %v4266_v60 = vpop.eup %4265 }
0x19bd   :  { %v3124_v61 = vmul.f32 %v4266_v60, %v4262_v11  ;;  %v3289_v21 = vpop.permute.xlu0 %3288 }
0x19bf   :  { %4037 = vmatmul.mubr.msk.f32.vlgmr.msra.gmra.mrb[30].mxu0 %vm162_vm2, %v3124_v61 }
0x19c0   :  { %v4268_v10 = vpop.eup %4267  ;;  %4136 = vmatpush3.bf16.msra.mxu0 %v4649_v42 }
0x19c1   :  { %v3125_v12 = vmul.f32 %v4268_v10, %v4264_v55  ;;  %4138 = vmatprep.subr.bf16.mxu0 %v4659_v54 }
0x19c3   :  { %4042 = vmatmul.mubr.msk.f32.vlgmr.msra.gmra.mrb[40].mxu1 %vm162_vm2, %v3125_v12 }
0x19c4   :  { %4140 = vmatpush3.bf16.msra.mxu0 %v4659_v54  ;;  %4144 = vmatpush3.bf16.msra.mxu1 %v4696_v40  ;;  %v3302_v54 = vsel %vm162_vm2, %v4832_v46, %v3281_v13  ;;  %v3291_v40 = vpop.permute.xlu1 %3290 }
0x19c5   :  { %4146 = vmatprep.subr.bf16.mxu1 %v4702_v41  ;;  %4150 = vmatprep.subr.bf16.mxu0 %v4707_v45  ;;  %v3304_v50 = vsel %vm1512_vm4, %v3302_v54, %v3289_v21  ;;  %v3305_v24 = vsel %vm1512_vm4, %v3303_v23, %v3291_v40 }
0x19c8   :  { %4148 = vmatpush3.bf16.msra.mxu1 %v4702_v41 }
0x1a92   :  { %v3198_v14 = vpop.f32.mrb[30].mxu0 }
0x1a93   :  { %3296 = vrot.lane.b32.xlu0 %v3198_v14, %s4391_s8  ;;  %v4038_v15 = vpop.f32.mrb[31].mxu0 }
0x1a96   :  { %v3274_v42 = vpop.f32.mrb[40].mxu1 }
0x1a97   :  { %3298 = vrot.lane.b32.xlu1 %v3274_v42, %s4391_s8  ;;  %v4043_v18 = vpop.f32.mrb[41].mxu1 }
0x1b05   :  { %v3297_v6 = vpop.permute.xlu0 %3296 }
0x1b06   :  { %v3306_v41 = vsel %vm1515_vm3, %v3304_v50, %v3297_v6 }
0x1b07   :  { %4052 = vmatprep.mubr.msk.f32.mxu0 %vm77_vm0, %v3306_v41 }
0x1b09   :  { %v3299_v25 = vpop.permute.xlu1 %3298 }
0x1b0a   :  { %v3307_v26 = vsel %vm1515_vm3, %v3305_v24, %v3299_v25 }
0x1b0b   :  { %4053 = vmatmul.mubr.msk.f32.vlgmr.msra.gmra.mrb[32].mxu0 %vm77_vm0, %v3307_v26 }
0x1b0c   :  { %4152 = vmatpush3.bf16.msra.mxu0 %v4707_v45 }
0x1b0d   :  { %4154 = vmatprep.subr.bf16.mxu0 %v4709_v47 }
0x1b10   :  { %4156 = vmatpush3.bf16.msra.mxu0 %v4709_v47 }
0x1b11   :  { %4158 = vmatprep.subr.bf16.mxu0 %v4714_v51 }
0x1b14   :  { %4160 = vmatpush3.bf16.msra.mxu0 %v4714_v51 }
0x1b15   :  { %4162 = vmatprep.subr.bf16.mxu0 %v4733_v20 }
0x1b18   :  { %4164 = vmatpush3.bf16.msra.mxu0 %v4733_v20 }
0x1bde   :  { %v4054_v46 = vpop.f32.mrb[32].mxu0 }
0x1bdf   :  { %v3386_v49 = vadd.f32 %v4054_v46, %v4680_v22  ;;  %v3380_v27 = vpop.f32.mrb[33].mxu0 }
0x1be0   :  { %v3381_v52 = vadd.f32 %v3380_v27, %v4680_v22 }
0x1be1   :  { %v3390_v45 = vadd.f32 %v3386_v49, %v4768_v63 }
0x1be2   :  { %v3389_v28 = vadd.f32 %v3381_v52, %v4765_v62 }
0x1be3   :  { %v3394_v47 = vsel %vm77_vm0, %v3390_v45, 0.0 }
0x1be4   :  { %3395 = vadd.xlane.f32.xlu1 %v3394_v47  ;;  %v3391_v29 = vsel %vm77_vm0, %v3389_v28, 0.0 }
0x1be5   :  { %3392 = vadd.xlane.f32.xlu0 %v3391_v29 }
0x1c71   :  { %v3396_v51 = vpop.xlane.xlu1 %3395 }
0x1c72   :  { %v3398_v30 = vmul.f32 0.03125, %v3396_v51  ;;  %v3393_v31 = vpop.xlane.xlu0 %3392 }
0x1c73   :  { %v3397_v20 = vmul.f32 0.03125, %v3393_v31 }
0x1c74   :  { %v3400_v32 = vsub.f32 %v3390_v45, %v3398_v30 }
0x1c75   :  { %v3399_v33 = vsub.f32 %v3389_v28, %v3397_v20 }
0x1c76   :  { %v3402_v22 = vmul.f32 %v3400_v32, %v3400_v32 }
0x1c77   :  { %v3401_v35 = vmul.f32 %v3399_v33, %v3399_v33 }
0x1c78   :  { %v3406_v63 = vsel %vm77_vm0, %v3402_v22, 0.0 }
0x1c79   :  { %v3403_v37 = vsel %vm77_vm0, %v3401_v35, 0.0 }
0x1c7a   :  { %3404 = vadd.xlane.f32.xlu0 %v3403_v37 }
0x1c7e   :  { %3407 = vadd.xlane.f32.xlu0 %v3406_v63 }
0x1d07   :  { %v3405_v62 = vpop.xlane.xlu0 %3404 }
0x1d08   :  { %v3409_v16 = vmul.f32 0.03125, %v3405_v62 }
0x1d0a   :  { %v3411_v7 = vadd.f32 1e-05, %v3409_v16 }
0x1d0b   :  { %v3408_v1 = vpop.xlane.xlu0 %3407 }
0x1d0c   :  { %4269 = vrsqrt.f32 %v3411_v7  ;;  %v3410_v39 = vmul.f32 0.03125, %v3408_v1 }
0x1d0e   :  { %v3412_v2 = vadd.f32 1e-05, %v3410_v39 }
0x1d10   :  { %4271 = vrsqrt.f32 %v3412_v2 }
0x1d16   :  { %v4270_v8 = vpop.eup %4269 }
0x1d17   :  { %v3415_v4 = vmul.f32 %v4270_v8, %v3399_v33 }
0x1d19   :  { %v3417_v36 = vmul.f32 %v3415_v4, %v4719_v59 }
0x1d1a   :  { %v4272_v43 = vpop.eup %4271 }
0x1d1b   :  { %v3416_v44 = vmul.f32 %v4272_v43, %v3400_v32  ;;  %v3419_v48 = vadd.f32 %v3417_v36, %v4722_v9 }
0x1d1d   :  { %4063 = vmatprep.mubr.msk.f32.mxu1 %vm77_vm0, %v3419_v48  ;;  %v3418_v53 = vmul.f32 %v3416_v44, %v4719_v59 }
0x1d1f   :  { %v3420_v11 = vadd.f32 %v3418_v53, %v4722_v9 }
0x1d21   :  { %4064 = vmatmul.mubr.msk.f32.vlgmr.msra.gmra.mrb[42].mxu1 %vm77_vm0, %v3420_v11 }
0x1df4   :  { %v4065_v38 = vpop.f32.mrb[42].mxu1 }
0x1df5   :  { %v3499_v55 = vadd.f32 %v4065_v38, %v4740_v3  ;;  %v3493_v5 = vpop.f32.mrb[43].mxu1 }
0x1df6   :  { %v3494_v34 = vadd.f32 %v3493_v5, %v4740_v3 }
0x1df7   :  { %v3503_v57 = vmax.f32 %v3499_v55, 0.0 }
0x1df8   :  { %v3502_v56 = vmax.f32 %v3494_v34, 0.0 }
0x1dfa   :  { %4082 = vmatprep.mubr.msk.f32.mxu0 %vm1750_vm5, %v3502_v56 }
0x1dfb   :  { %4083 = vmatmul.mubr.msk.f32.vlgmr.msra.gmra.mrb[34].mxu0 %vm1750_vm5, %v3503_v57 }
0x1ece   :  { %v4084_v60 = vpop.f32.mrb[34].mxu0 }
0x1ecf   :  { %v3582_v61 = vadd.f32 %v4084_v60, %v4692_v0  ;;  %v3576_v59 = vpop.f32.mrb[35].mxu0 }
0x1ed0   :  { %v3577_v9 = vadd.f32 %v3576_v59, %v4692_v0 }
0x1ed1   :  { %v3586_v10 = vadd.f32 %v3582_v61, %v3420_v11 }
0x1ed2   :  { %v3585_v12 = vadd.f32 %v3577_v9, %v3419_v48 }
0x1ed3   :  { %v3590_v14 = vsel %vm77_vm0, %v3586_v10, 0.0 }
0x1ed4   :  { %3591 = vadd.xlane.f32.xlu0 %v3590_v14  ;;  %v3587_v15 = vsel %vm77_vm0, %v3585_v12, 0.0 }
0x1ed5   :  { %3588 = vadd.xlane.f32.xlu1 %v3587_v15 }
0x1f61   :  { %v3592_v3 = vpop.xlane.xlu0 %3591 }
0x1f62   :  { %v3594_v42 = vmul.f32 0.03125, %v3592_v3  ;;  %v3589_v18 = vpop.xlane.xlu1 %3588 }
0x1f63   :  { %v3593_v13 = vmul.f32 0.03125, %v3589_v18 }
0x1f64   :  { %v3596_v19 = vsub.f32 %v3586_v10, %v3594_v42 }
0x1f65   :  { %v3595_v21 = vsub.f32 %v3585_v12, %v3593_v13 }
0x1f66   :  { %v3598_v54 = vmul.f32 %v3596_v19, %v3596_v19 }
0x1f67   :  { %v3597_v40 = vmul.f32 %v3595_v21, %v3595_v21 }
0x1f68   :  { %v3602_v50 = vsel %vm77_vm0, %v3598_v54, 0.0 }
0x1f69   :  { %3603 = vadd.xlane.f32.xlu0 %v3602_v50  ;;  %v3599_v0 = vsel %vm77_vm0, %v3597_v40, 0.0 }
0x1f6a   :  { %3600 = vadd.xlane.f32.xlu1 %v3599_v0 }
0x1ff6   :  { %v3604_v6 = vpop.xlane.xlu0 %3603 }
0x1ff7   :  { %v3606_v41 = vmul.f32 0.03125, %v3604_v6  ;;  %v3601_v23 = vpop.xlane.xlu1 %3600 }
0x1ff8   :  { %v3605_v24 = vmul.f32 0.03125, %v3601_v23 }
0x1ff9   :  { %v3608_v25 = vadd.f32 1e-05, %v3606_v41 }
0x1ffa   :  { %v3607_v26 = vadd.f32 1e-05, %v3605_v24 }
0x1ffb   :  { %4273 = vrsqrt.f32 %v3608_v25 }
0x1ffc   :  { %4275 = vrsqrt.f32 %v3607_v26 }
0x2005   :  { %v4274_v46 = vpop.eup %4273 }
0x2006   :  { %v4276_v49 = vpop.eup %4275  ;;  %v3612_v27 = vmul.f32 %v4274_v46, %v3596_v19 }
0x2007   :  { %v3611_v52 = vmul.f32 %v4276_v49, %v3595_v21 }
0x2008   :  { %v3614_v45 = vmul.f32 %v3612_v27, %v4757_v17 }
0x2009   :  { %v3613_v28 = vmul.f32 %v3611_v52, %v4757_v17 }
0x200a   :  { %v3616_v47 = vadd.f32 %v3614_v45, %v4760_v58 }
0x200b   :  { %v3615_v29 = vadd.f32 %v3613_v28, %v4760_v58 }
0x200c   :  { %3618 = vst.msk [vmem:[#allocation8 + $0x8] sm:$0xff] %vm77_vm0, %v3616_v47 }
0x200d   :  { %3617 = vst.msk [vmem:[#allocation8] sm:$0xff] %vm77_vm0, %v3615_v29 }
0x200e   :  { %4354 = shalt.err (!%p4351_p0)
}
0x200f   :  { %s4355_s13 = scalar_lea.hbm %s5000_s3, 256 }
0x2010   :  { %p4356_p1 = scmp.ne.s32.totalorder %s5000_s3, %s4355_s13  ;;  %p4359_p2 = scmp.lt.u32.totalorder %s4355_s13, %s5000_s3 }
0x2012   :  { %p4361_p3 = pnand %p4359_p2, %p4356_p1 }
0x2014   :  { %4364 = shalt.err (!%p4361_p3)
}
0x2015   :  { %3630 = dma.vmem_to_hbm [thread:$0]  %s3625_s9, 256, %s5000_s3, [#allocation4], %s4373_s24, %s4373_s24, %s4374_s25  }
0x2016   :  { %4369 = dma.done.wait [#allocation4], 256  }
0x2017   :  { %4370 = vsyncadd [#allocation4], 4294967040 }
0x2018   :  { %3634 = vsyncpa [#allocation3], 1 }
0x2019   :  { %3635 = vsyncpa [#allocation6], 1 }
0x201a   :  { %3636 = vsyncpa [#allocation4], 1 }

</bundles_post_ra>
